<compile_context>
chip_gen: v5e
topology: v5e:2x2
jax: 0.10.0
libtpu: 0.0.40
codegen_flags: <defaults>
</compile_context>

<pallas_src>
import functools

import jax
import jax.numpy as jnp
from jax import lax
from jax.experimental import pallas as pl
from jax.experimental.pallas import tpu as pltpu

_NEG_INF = -1e30
_LANE = 128
_SUB = 8


def _round_up(x, m):
    return (x + m - 1) // m * m


def _nbytes(shape, dtype):
    n = 1
    for s in shape:
        n *= s
    return n * jnp.dtype(dtype).itemsize


def _tpu_vmem_capacity_bytes():
    try:
        return int(pltpu.get_tpu_info().vmem_capacity_bytes)
    except Exception:
        return 64 << 20        # conservative fallback: v7x per-TensorCore VMEM


def _const_spec(shape, single_buffer):
    """BlockSpec for a weight/bias whose block index is constant over the grid."""
    nd = len(shape)
    idx = lambda *args: (0,) * nd
    if single_buffer:
        return pl.BlockSpec(shape, idx, pipeline_mode=pl.Buffered(1))
    return pl.BlockSpec(shape, idx)


# --------------------------------------------------------------------------
# Kernel A: KV projection  (enc @ Wkv' + bkv') -> bf16, K|V lane-partitioned
# --------------------------------------------------------------------------
def _kv_proj_kernel(enc_ref, wkv_ref, bkv_ref, kv_ref):
    # enc_ref: (Ta, Dp) input dtype (cast in-kernel), wkv_ref: (Dp, 2*Ehp) bf16,
    # bkv_ref: (1, 2*Ehp) f32, kv_ref: (Ta, 2*Ehp) bf16.
    acc = jnp.dot(enc_ref[...].astype(jnp.bfloat16), wkv_ref[...],
                  preferred_element_type=jnp.float32)
    kv_ref[...] = (acc + bkv_ref[...]).astype(kv_ref.dtype)


# --------------------------------------------------------------------------
# Kernel B: fused q-projection + flash attention + output projection
# --------------------------------------------------------------------------
def _flash_cross_attn_kernel(x_ref, kv_ref, wq_ref, bq_ref, wo_ref, bo_ref,
                             o_ref, q_scr, m_scr, l_scr, acc_scr,
                             *, num_heads, hd_pad, e_hp, kv_len, kv_tile,
                             kv_is_padded, kv_resident):
    ik = pl.program_id(2)

    @pl.when(ik == 0)
    def _init():
        # Q projection once per (batch, q-tile); scale already folded into Wq/bq.
        q = jnp.dot(x_ref[...].astype(jnp.bfloat16), wq_ref[...],
                    preferred_element_type=jnp.float32) + bq_ref[...]
        q_scr[...] = q.astype(jnp.bfloat16)
        m_scr[...] = jnp.full(m_scr.shape, _NEG_INF, jnp.float32)
        l_scr[...] = jnp.zeros(l_scr.shape, jnp.float32)
        acc_scr[...] = jnp.zeros(acc_scr.shape, jnp.float32)

    # Padded-KV additive bias, hoisted out of the per-head loop.
    # Padding is confined to the tail kv tile, so the first tile always has at
    # least one valid column and the online-softmax max is finite afterwards.
    if kv_is_padded:
        col = lax.broadcasted_iota(jnp.int32, (1, kv_tile), 1) + ik * kv_tile
        bias = jnp.where(col < kv_len, 0.0, _NEG_INF).astype(jnp.float32)
    else:
        bias = None

    if kv_resident:
        kv_start = pl.multiple_of(ik * kv_tile, _SUB)

    for h in range(num_heads):          # static unrolled loop, lane-aligned slices
        lo = h * hd_pad
        hi = lo + hd_pad
        q_h = q_scr[:, lo:hi]                                    # (Tq,  hdp) bf16
        if kv_resident:
            k_h = kv_ref[pl.ds(kv_start, kv_tile), lo:hi]        # (Tkv, hdp) bf16
            v_h = kv_ref[pl.ds(kv_start, kv_tile), e_hp + lo:e_hp + hi]
        else:
            k_h = kv_ref[:, lo:hi]
            v_h = kv_ref[:, e_hp + lo:e_hp + hi]

        # scores = q_h @ k_h.T  (f32 accumulation on the MXU)
        s = lax.dot_general(q_h, k_h, (((1,), (1,)), ((), ())),
                            preferred_element_type=jnp.float32)  # (Tq, Tkv)
        if bias is not None:
            s = s + bias

        m_prev = m_scr[h]                                        # (Tq, 1)
        l_prev = l_scr[h]
        m_new = jnp.maximum(m_prev, jnp.max(s, axis=-1, keepdims=True))
        alpha = jnp.exp(m_prev - m_new)
        p = jnp.exp(s - m_new)                                   # (Tq, Tkv) f32
        l_scr[h] = alpha * l_prev + jnp.sum(p, axis=-1, keepdims=True)
        m_scr[h] = m_new

        pv = jnp.dot(p.astype(jnp.bfloat16), v_h,
                     preferred_element_type=jnp.float32)         # (Tq, hdp)
        acc_scr[:, lo:hi] = alpha * acc_scr[:, lo:hi] + pv

    @pl.when(ik == pl.num_programs(2) - 1)
    def _finish():
        for h in range(num_heads):
            lo = h * hd_pad
            hi = lo + hd_pad
            inv = pl.reciprocal(l_scr[h], approx=False)          # exact, once/q-tile
            acc_scr[:, lo:hi] = acc_scr[:, lo:hi] * inv
        out = jnp.dot(acc_scr[...].astype(jnp.bfloat16), wo_ref[...],
                      preferred_element_type=jnp.float32) + bo_ref[...]
        o_ref[...] = out.astype(o_ref.dtype)


# --------------------------------------------------------------------------
# Parameter packing (once, off the forward path)
# --------------------------------------------------------------------------
def pack_params(params, num_heads):
    wq, bq, wkv, bkv, wo, bo = params
    D, E = wq.shape
    assert E % num_heads == 0
    H = num_heads
    hd = E // H
    scale = float(hd) ** -0.5
    f32, bf16 = jnp.float32, jnp.bfloat16

    hdp = _round_up(hd, _LANE)
    Dp = _round_up(D, _LANE)
    Ehp = H * hdp
    Ep = _round_up(E, _LANE)

    bq = jnp.reshape(bq, (1, E))
    bkv = jnp.reshape(bkv, (1, 2 * E))
    bo = jnp.reshape(bo, (1, E))

    # Q projection: fold softmax scale, pad head_dim -> hdp and D -> Dp.
    wq_h = (wq.astype(f32) * scale).reshape(D, H, hd)
    wq_h = jnp.pad(wq_h, ((0, Dp - D), (0, 0), (0, hdp - hd))).reshape(Dp, Ehp)
    bq_h = (bq.astype(f32) * scale).reshape(1, H, hd)
    bq_h = jnp.pad(bq_h, ((0, 0), (0, 0), (0, hdp - hd))).reshape(1, Ehp)

    # KV projection: de-interleave per-head (k, v) columns so K -> [0:Ehp),
    # V -> [Ehp:2*Ehp); matches torch's reshape(...,H,2*hd).chunk(2, dim=-1).
    wkv4 = wkv.astype(f32).reshape(D, H, 2, hd)
    bkv4 = bkv.astype(f32).reshape(1, H, 2, hd)
    pad_w = ((0, Dp - D), (0, 0), (0, hdp - hd))
    pad_b = ((0, 0), (0, 0), (0, hdp - hd))
    wk_h = jnp.pad(wkv4[:, :, 0, :], pad_w).reshape(Dp, Ehp)
    wv_h = jnp.pad(wkv4[:, :, 1, :], pad_w).reshape(Dp, Ehp)
    wkv_h = jnp.concatenate([wk_h, wv_h], axis=1)                 # (Dp, 2*Ehp)
    bk_h = jnp.pad(bkv4[:, :, 0, :], pad_b).reshape(1, Ehp)
    bv_h = jnp.pad(bkv4[:, :, 1, :], pad_b).reshape(1, Ehp)
    bkv_h = jnp.concatenate([bk_h, bv_h], axis=1)                 # (1, 2*Ehp)

    # Output projection: rows reordered to padded head-major value layout.
    wo_h = wo.astype(f32).reshape(H, hd, E)
    wo_h = jnp.pad(wo_h, ((0, 0), (0, hdp - hd), (0, Ep - E))).reshape(Ehp, Ep)
    bo_h = jnp.pad(bo.astype(f32), ((0, 0), (0, Ep - E)))          # (1, Ep)

    packed = dict(
        wq=wq_h.astype(bf16), bq=bq_h,
        wkv=wkv_h.astype(bf16), bkv=bkv_h,
        wo=wo_h.astype(bf16), bo=bo_h,
        num_heads=H, head_dim=hd, hd_pad=hdp, D=D, Dp=Dp, E=E, Ep=Ep, Ehp=Ehp)
    for k, v in packed.items():
        if isinstance(v, jax.Array):
            packed[k] = jax.block_until_ready(v)   # materialize once, here
    return packed


# --------------------------------------------------------------------------
# Forward
# --------------------------------------------------------------------------
def _forward(x, enc_out, packed, *, q_tile, kv_tile, kv_resident_override,
             single_buffer_weights):
    B, Sq, D = x.shape
    Bk, Skv, Dk = enc_out.shape
    assert Bk == B and D == packed["D"] and Dk == packed["D"]
    H = packed["num_heads"]
    hdp = packed["hd_pad"]
    Dp, Ehp, Ep, E = packed["Dp"], packed["Ehp"], packed["Ep"], packed["E"]
    f32, bf16 = jnp.float32, jnp.bfloat16
    out_dtype = x.dtype

    # ---- tiles ----
    Tq = q_tile if q_tile is not None else min(256, Sq)
    Tkv = kv_tile if kv_tile is not None else min(256, Skv)
    Tq = _round_up(max(int(Tq), 1), _SUB)
    Tkv = _round_up(max(int(Tkv), 1), _SUB)
    # v7x megacore: keep at least 2 steps on the parallel axes when possible.
    while B * ((Sq + Tq - 1) // Tq) < 2 and Tq > _SUB:
        Tq = _round_up(max(Tq // 2, _SUB), _SUB)
    Sqp = _round_up(Sq, Tq)
    Skvp = _round_up(Skv, Tkv)
    nq = Sqp // Tq
    nkv = Skvp // Tkv

    # Kernel A row tile: a multiple of Tkv near 512 rows that divides Skvp, so
    # both kernels share the same Skvp / tail-padding convention.
    ta_mult = max(1, min(nkv, max(1, 512 // Tkv)))
    while nkv % ta_mult != 0:
        ta_mult -= 1
    Ta = ta_mult * Tkv
    nka = Skvp // Ta

    # ---- activations: zero-pad only when needed; dtype cast happens in-kernel ----
    if Sqp != Sq or Dp != D:
        x_p = jnp.pad(x, ((0, 0), (0, Sqp - Sq), (0, Dp - D)))
    else:
        x_p = x
    if Skvp != Skv or Dp != D:
        enc_p = jnp.pad(enc_out, ((0, 0), (0, Skvp - Skv), (0, Dp - D)))
    else:
        enc_p = enc_out

    # ---- per-generation VMEM budget ----
    vmem_cap = _tpu_vmem_capacity_bytes()
    usable = max(vmem_cap - (12 << 20), 16 << 20)
    wbuf = 1 if single_buffer_weights else 2
    slack = 8 << 20

    # ---- Kernel A: KV projection ----
    vmem_a = (2 * _nbytes((Ta, Dp), enc_p.dtype)
              + wbuf * (_nbytes((Dp, 2 * Ehp), bf16) + _nbytes((1, 2 * Ehp), f32))
              + 2 * _nbytes((Ta, 2 * Ehp), bf16)
              + slack)
    vmem_a = int(min(vmem_a, usable))

    kv_proj = pl.pallas_call(
        _kv_proj_kernel,
        out_shape=jax.ShapeDtypeStruct((B, Skvp, 2 * Ehp), bf16),
        grid_spec=pltpu.PrefetchScalarGridSpec(
            num_scalar_prefetch=0,
            grid=(B, nka),
            in_specs=[
                pl.BlockSpec((None, Ta, Dp), lambda b, k: (b, k, 0)),
                _const_spec((Dp, 2 * Ehp), single_buffer_weights),
                _const_spec((1, 2 * Ehp), single_buffer_weights),
            ],
            out_specs=pl.BlockSpec((None, Ta, 2 * Ehp), lambda b, k: (b, k, 0)),
        ),
        compiler_params=pltpu.CompilerParams(
            dimension_semantics=("parallel", "parallel"),
            vmem_limit_bytes=vmem_a),
    )(enc_p, packed["wkv"], packed["bkv"])

    # ---- Kernel B: fused q-proj + flash attention + out-proj ----
    fixed_b = (2 * _nbytes((Tq, Dp), x_p.dtype)
               + wbuf * (_nbytes((Dp, Ehp), bf16) + _nbytes((1, Ehp), f32)
                         + _nbytes((Ehp, Ep), bf16) + _nbytes((1, Ep), f32))
               + 2 * _nbytes((Tq, Ep), out_dtype)
               + _nbytes((Tq, Ehp), bf16) + _nbytes((Tq, Ehp), f32)   # q/acc scratch
               + 2 * H * Tq * _LANE * 4                               # m/l scratch
               + 6 * _nbytes((Tq, Tkv), f32)                          # score temps
               + slack)
    kv_resident = (fixed_b + 2 * _nbytes((Skvp, 2 * Ehp), bf16)) <= usable
    if kv_resident_override is not None:
        kv_resident = bool(kv_resident_override)
    kv_rows = Skvp if kv_resident else Tkv
    vmem_b = int(min(fixed_b + 2 * _nbytes((kv_rows, 2 * Ehp), bf16), usable))

    if kv_resident:
        # Full KV slab resident per batch: block index constant across i and k
        # -> DMA'd once per batch; kv tiles are walked with in-kernel pl.ds.
        kv_spec = pl.BlockSpec((None, Skvp, 2 * Ehp), lambda b, i, k: (b, 0, 0))
    else:
        kv_spec = pl.BlockSpec((None, Tkv, 2 * Ehp), lambda b, i, k: (b, k, 0))

    kernel = functools.partial(
        _flash_cross_attn_kernel,
        num_heads=H, hd_pad=hdp, e_hp=Ehp,
        kv_len=Skv, kv_tile=Tkv,
        kv_is_padded=(Skvp != Skv), kv_resident=kv_resident)

    out_p = pl.pallas_call(
        kernel,
        out_shape=jax.ShapeDtypeStruct((B, Sqp, Ep), out_dtype),
        grid_spec=pltpu.PrefetchScalarGridSpec(
            num_scalar_prefetch=0,
            grid=(B, nq, nkv),
            in_specs=[
                pl.BlockSpec((None, Tq, Dp), lambda b, i, k: (b, i, 0)),   # x
                kv_spec,                                                    # kv
                _const_spec((Dp, Ehp), single_buffer_weights),              # Wq
                _const_spec((1, Ehp), single_buffer_weights),               # bq
                _const_spec((Ehp, Ep), single_buffer_weights),              # Wo
                _const_spec((1, Ep), single_buffer_weights),                # bo
            ],
            out_specs=pl.BlockSpec((None, Tq, Ep), lambda b, i, k: (b, i, 0)),
            scratch_shapes=[
                pltpu.VMEM((Tq, Ehp), bf16),        # q tile (scale folded in)
                pltpu.VMEM((H, Tq, 1), f32),        # running max per head
                pltpu.VMEM((H, Tq, 1), f32),        # running denom per head
                pltpu.VMEM((Tq, Ehp), f32),         # output accumulator
            ],
        ),
        compiler_params=pltpu.CompilerParams(
            dimension_semantics=("parallel", "parallel", "arbitrary"),
            vmem_limit_bytes=vmem_b),
    )(x_p, kv_proj, packed["wq"], packed["bq"], packed["wo"], packed["bo"])

    return out_p[:, :Sq, :E]


def multihead_cross_attention(x, enc_out, packed, *, q_tile=None, kv_tile=None,
                              kv_resident_override=None):
    try:
        return _forward(x, enc_out, packed, q_tile=q_tile, kv_tile=kv_tile,
                        kv_resident_override=kv_resident_override,
                        single_buffer_weights=True)
    except Exception:
        # pipeline_mode=pl.Buffered(1) not supported by this jax version ->
        # fall back to default double-buffered constant weights.
        return _forward(x, enc_out, packed, q_tile=q_tile, kv_tile=kv_tile,
                        kv_resident_override=kv_resident_override,
                        single_buffer_weights=False)


# --------------------------------------------------------------------------
# Reference + init helpers
# --------------------------------------------------------------------------
def xavier_uniform(key, fan_in, fan_out, dtype=jnp.float32):
    a = (6.0 / (fan_in + fan_out)) ** 0.5
    return jax.random.uniform(key, (fan_in, fan_out), dtype, minval=-a, maxval=a)


def reference_forward(x, enc_out, params, num_heads):
    wq, bq, wkv, bkv, wo, bo = params
    B, Sq, D = x.shape
    Skv = enc_out.shape[1]
    E = wq.shape[1]
    hd = E // num_heads
    scale = hd ** -0.5
    q = x @ wq + bq
    kv = enc_out @ wkv + bkv
    q = q.reshape(B, Sq, num_heads, hd).transpose(0, 2, 1, 3)
    kv = kv.reshape(B, Skv, num_heads, 2 * hd).transpose(0, 2, 1, 3)
    k, v = kv[..., :hd], kv[..., hd:]
    s = jnp.einsum('bhqd,bhkd->bhqk', q, k) * scale
    a = jax.nn.softmax(s, axis=-1)
    vals = jnp.einsum('bhqk,bhkd->bhqd', a, v)
    vals = vals.transpose(0, 2, 1, 3).reshape(B, Sq, E)
    return vals @ wo + bo


if __name__ == "__main__":
    # Small shapes; Skv chosen non-multiple of the kv tile to exercise both the
    # multi-tile online softmax and the padded-KV masking path.
    B, Sq, Skv = 2, 8, 20
    input_dim = 32
    embed_dim = 32
    num_heads = 4

    key = jax.random.PRNGKey(0)
    kx, kenc, kq, kkv, ko = jax.random.split(key, 5)

    x = jax.random.normal(kx, (B, Sq, input_dim), jnp.float32)
    enc_out = jax.random.normal(kenc, (B, Skv, input_dim), jnp.float32)

    # xavier_uniform weights, zero biases (matches _reset_parameters()).
    wq = xavier_uniform(kq, input_dim, embed_dim)
    bq = jnp.zeros((1, embed_dim), jnp.float32)
    wkv = xavier_uniform(kkv, input_dim, 2 * embed_dim)
    bkv = jnp.zeros((1, 2 * embed_dim), jnp.float32)
    wo = xavier_uniform(ko, embed_dim, embed_dim)
    bo = jnp.zeros((1, embed_dim), jnp.float32)
    params = (wq, bq, wkv, bkv, wo, bo)

    packed = pack_params(params, num_heads)
    ref = reference_forward(x, enc_out, params, num_heads)

    # Default (KV-resident) path.
    out = multihead_cross_attention(x, enc_out, packed, q_tile=8, kv_tile=8)
    out = jax.block_until_ready(out)
    assert out.shape == (B, Sq, embed_dim)
    err = float(jnp.max(jnp.abs(out - ref)))
    assert jnp.allclose(out, ref, atol=4e-2, rtol=4e-2), \
        f"resident-KV path mismatch vs JAX reference, max abs err {err}"

    # Forced KV-streaming path (used when the slab does not fit VMEM) must agree.
    out_s = multihead_cross_attention(x, enc_out, packed, q_tile=8, kv_tile=8,
                                      kv_resident_override=False)
    out_s = jax.block_until_ready(out_s)
    err_s = float(jnp.max(jnp.abs(out_s - ref)))
    assert jnp.allclose(out_s, ref, atol=4e-2, rtol=4e-2), \
        f"streamed-KV path mismatch vs JAX reference, max abs err {err_s}"

    print("KERNEL_OK")
</pallas_src>

<mosaic_0001>
module attributes {stable_mosaic.version = 11 : i64} {
  func.func @_kv_proj_kernel(%arg0: i32, %arg1: i32, %arg2: memref<1x24x128xf32, #tpu.memory_space<vmem>>, %arg3: memref<128x1024xbf16, #tpu.memory_space<vmem>>, %arg4: memref<1x1024xf32, #tpu.memory_space<vmem>>, %arg5: memref<1x24x1024xbf16, #tpu.memory_space<vmem>>) attributes {dimension_semantics = [#tpu.dimension_semantics<parallel>, #tpu.dimension_semantics<parallel>], iteration_bounds = array<i64: 2, 1>, scalar_prefetch = 0 : i64, scratch_operands = 0 : i64, tpu.core_type = #tpu.core_type<tc>, window_params = [{transform_indices = @transform_0, window_bounds = array<i64: 1, 24, 128>}, {pipeline_mode = #tpu.pipeline_mode<synchronous>, transform_indices = @transform_1, window_bounds = array<i64: 128, 1024>}, {pipeline_mode = #tpu.pipeline_mode<synchronous>, transform_indices = @transform_2, window_bounds = array<i64: 1, 1024>}, {transform_indices = @transform_3, window_bounds = array<i64: 1, 24, 1024>}]} {
    %c0 = arith.constant 0 : index
    %c0_0 = arith.constant 0 : index
    %c0_1 = arith.constant 0 : index
    %0 = vector.load %arg2[%c0, %c0_0, %c0_1] : memref<1x24x128xf32, #tpu.memory_space<vmem>>, vector<1x24x128xf32>
    %1 = vector.shape_cast %0 : vector<1x24x128xf32> to vector<24x128xf32>
    %2 = arith.truncf %1 : vector<24x128xf32> to vector<24x128xbf16>
    %c0_2 = arith.constant 0 : index
    %c0_3 = arith.constant 0 : index
    %3 = vector.load %arg3[%c0_2, %c0_3] : memref<128x1024xbf16, #tpu.memory_space<vmem>>, vector<128x1024xbf16>
    %cst = arith.constant dense<0.000000e+00> : vector<24x1024xf32>
    %4 = tpu.matmul %2, %3, %cst {dimension_numbers = #tpu.dot_dimension_numbers<[1], [0], [0], [1], [0, 0, 1, 1], [], []>} : vector<24x128xbf16>, vector<128x1024xbf16>, vector<24x1024xf32> -> vector<24x1024xf32>
    %c0_4 = arith.constant 0 : index
    %c0_5 = arith.constant 0 : index
    %5 = vector.load %arg4[%c0_4, %c0_5] : memref<1x1024xf32, #tpu.memory_space<vmem>>, vector<1x1024xf32>
    %6 = vector.broadcast %5 : vector<1x1024xf32> to vector<24x1024xf32>
    %7 = arith.addf %4, %6 : vector<24x1024xf32>
    %8 = arith.truncf %7 : vector<24x1024xf32> to vector<24x1024xbf16>
    %c0_6 = arith.constant 0 : index
    %c0_7 = arith.constant 0 : index
    %c0_8 = arith.constant 0 : index
    %9 = vector.load %arg5[%c0_6, %c0_7, %c0_8] : memref<1x24x1024xbf16, #tpu.memory_space<vmem>>, vector<1x24x1024xbf16>
    %10 = vector.shape_cast %9 : vector<1x24x1024xbf16> to vector<24x1024xbf16>
    %11 = vector.shape_cast %8 : vector<24x1024xbf16> to vector<1x24x1024xbf16>
    tpu.vector_store %arg5[%c0_6, %c0_7, %c0_8], %11 {strides = array<i32>} : memref<1x24x1024xbf16, #tpu.memory_space<vmem>>, vector<1x24x1024xbf16>,
    return
  }
  func.func @transform_0(%arg0: i32, %arg1: i32) -> (i32, i32, i32) {
    %c0_i32 = arith.constant 0 : i32
    %c0_i32_0 = arith.constant 0 : i32
    return %arg0, %arg1, %c0_i32 : i32, i32, i32
  }
  func.func @transform_1(%arg0: i32, %arg1: i32) -> (i32, i32) {
    %c0_i32 = arith.constant 0 : i32
    %c0_i32_0 = arith.constant 0 : i32
    %c0_i32_1 = arith.constant 0 : i32
    return %c0_i32, %c0_i32_0 : i32, i32
  }
  func.func @transform_2(%arg0: i32, %arg1: i32) -> (i32, i32) {
    %c0_i32 = arith.constant 0 : i32
    %c0_i32_0 = arith.constant 0 : i32
    %c0_i32_1 = arith.constant 0 : i32
    return %c0_i32, %c0_i32_0 : i32, i32
  }
  func.func @transform_3(%arg0: i32, %arg1: i32) -> (i32, i32, i32) {
    %c0_i32 = arith.constant 0 : i32
    %c0_i32_0 = arith.constant 0 : i32
    return %arg0, %arg1, %c0_i32 : i32, i32, i32
  }
}

module attributes {stable_mosaic.version = 11 : i64} {
  func.func @_kv_proj_kernel(%arg0: i32, %arg1: i32, %arg2: memref<1x24x128xf32, #tpu.memory_space<vmem>>, %arg3: memref<128x1024xbf16, #tpu.memory_space<vmem>>, %arg4: memref<1x1024xf32, #tpu.memory_space<vmem>>, %arg5: memref<1x24x1024xbf16, #tpu.memory_space<vmem>>) attributes {dimension_semantics = [#tpu.dimension_semantics<parallel>, #tpu.dimension_semantics<parallel>], iteration_bounds = array<i64: 2, 1>, scalar_prefetch = 0 : i64, scratch_operands = 0 : i64, tpu.core_type = #tpu.core_type<tc>, window_params = [{transform_indices = @transform_0, window_bounds = array<i64: 1, 24, 128>}, {pipeline_mode = #tpu.pipeline_mode<synchronous>, transform_indices = @transform_1, window_bounds = array<i64: 128, 1024>}, {pipeline_mode = #tpu.pipeline_mode<synchronous>, transform_indices = @transform_2, window_bounds = array<i64: 1, 1024>}, {transform_indices = @transform_3, window_bounds = array<i64: 1, 24, 1024>}]} {
    %c0 = arith.constant 0 : index
    %c0_0 = arith.constant 0 : index
    %c0_1 = arith.constant 0 : index
    %0 = vector.load %arg2[%c0, %c0_0, %c0_1] : memref<1x24x128xf32, #tpu.memory_space<vmem>>, vector<1x24x128xf32>
    %1 = vector.shape_cast %0 : vector<1x24x128xf32> to vector<24x128xf32>
    %2 = arith.truncf %1 : vector<24x128xf32> to vector<24x128xbf16>
    %c0_2 = arith.constant 0 : index
    %c0_3 = arith.constant 0 : index
    %3 = vector.load %arg3[%c0_2, %c0_3] : memref<128x1024xbf16, #tpu.memory_space<vmem>>, vector<128x1024xbf16>
    %cst = arith.constant dense<0.000000e+00> : vector<24x1024xf32>
    %4 = tpu.matmul %2, %3, %cst {dimension_numbers = #tpu.dot_dimension_numbers<[1], [0], [0], [1], [0, 0, 1, 1], [], []>} : vector<24x128xbf16>, vector<128x1024xbf16>, vector<24x1024xf32> -> vector<24x1024xf32>
    %c0_4 = arith.constant 0 : index
    %c0_5 = arith.constant 0 : index
    %5 = vector.load %arg4[%c0_4, %c0_5] : memref<1x1024xf32, #tpu.memory_space<vmem>>, vector<1x1024xf32>
    %6 = vector.broadcast %5 : vector<1x1024xf32> to vector<24x1024xf32>
    %7 = arith.addf %4, %6 : vector<24x1024xf32>
    %8 = arith.truncf %7 : vector<24x1024xf32> to vector<24x1024xbf16>
    %c0_6 = arith.constant 0 : index
    %c0_7 = arith.constant 0 : index
    %c0_8 = arith.constant 0 : index
    %9 = vector.load %arg5[%c0_6, %c0_7, %c0_8] : memref<1x24x1024xbf16, #tpu.memory_space<vmem>>, vector<1x24x1024xbf16>
    %10 = vector.shape_cast %9 : vector<1x24x1024xbf16> to vector<24x1024xbf16>
    %11 = vector.shape_cast %8 : vector<24x1024xbf16> to vector<1x24x1024xbf16>
    tpu.vector_store %arg5[%c0_6, %c0_7, %c0_8], %11 {strides = array<i32>} : memref<1x24x1024xbf16, #tpu.memory_space<vmem>>, vector<1x24x1024xbf16>,
    return
  }
  func.func @transform_0(%arg0: i32, %arg1: i32) -> (i32, i32, i32) {
    %c0_i32 = arith.constant 0 : i32
    %c0_i32_0 = arith.constant 0 : i32
    return %arg0, %arg1, %c0_i32 : i32, i32, i32
  }
  func.func @transform_1(%arg0: i32, %arg1: i32) -> (i32, i32) {
    %c0_i32 = arith.constant 0 : i32
    %c0_i32_0 = arith.constant 0 : i32
    %c0_i32_1 = arith.constant 0 : i32
    return %c0_i32, %c0_i32_0 : i32, i32
  }
  func.func @transform_2(%arg0: i32, %arg1: i32) -> (i32, i32) {
    %c0_i32 = arith.constant 0 : i32
    %c0_i32_0 = arith.constant 0 : i32
    %c0_i32_1 = arith.constant 0 : i32
    return %c0_i32, %c0_i32_0 : i32, i32
  }
  func.func @transform_3(%arg0: i32, %arg1: i32) -> (i32, i32, i32) {
    %c0_i32 = arith.constant 0 : i32
    %c0_i32_0 = arith.constant 0 : i32
    return %arg0, %arg1, %c0_i32 : i32, i32, i32
  }
}

</mosaic_0001>

<bundles_post_ra>
// kernel: tpu_custom_call.1
= control target key start
LH: loop header
LB: loop body
LE: loop exit
PB: predicated region body
PF: predicated region fallthrough
CT: control target
= control target key end

     0   :  { %8 = vsyncpa [#allocation3], 0  ;;  %s1762_s0 = inlined_call_operand.hbm [shape: f32[2,24,128], index: 0, kind: input, shape index: {}]   ;;  %s1763_s1 = inlined_call_operand.hbm [shape: bf16[128,1024], index: 1, kind: input, shape index: {}]   ;;  %s1764_s2 = inlined_call_operand.hbm [shape: f32[1,1024], index: 2, kind: input, shape index: {}]   ;;  %s1765_s3 = inlined_call_operand.hbm [shape: bf16[2,24,1024], index: 3, kind: output, shape index: {}]  }
   0x1   :  { %10 = vsyncpa [#allocation3 + $0x1], 0 }
   0x2   :  { %11 = vsyncpa [#allocation6], 0 }
   0x3   :  { %12 = vsyncpa [#allocation4], 0 }
   0x4   :  { %14 = vsyncpa [#allocation4 + $0x1], 0  ;;  %s1575_s12 = smov 0   ;;  %s1577_s13 = smov 0  }
   0x5   :  { %s1579_s14 = smov 0   ;;  %s1581_s15 = smov 0  }
   0x6   :  { %s1583_s16 = smov 0   ;;  %s1585_s17 = smov 0  }
   0x7 LB: > { %s942_s18 = sadd.s32 4294967295, %s1545_s17   ;;  %s943_s19 = sadd.s32 4294967294, %s1545_s17   ;;  %s1545_s17 = sphi %s1585_s17, %s20_s17   ;;  %s1541_s16 = sphi %s1583_s16, %s1776_s16   ;;  %s1537_s15 = sphi %s1581_s15, %s1775_s15   ;;  %s1533_s14 = sphi %s1579_s14, %s1774_s14   ;;  %s1529_s13 = sphi %s1577_s13, %s1773_s13   ;;  %s1525_s12 = sphi %s1575_s12, %s1772_s12  }
   0x8   : > { %p54_p0 = scmp.ne.s32.totalorder %s1529_s13, %s1525_s12  ;;  %p1609_p1 = scmp.eq.s32.totalorder %s942_s18, 0 }
   0x9   : > { %p1613_p2 = scmp.eq.s32.totalorder %s942_s18, 1  ;;  %p128_p3 = scmp.eq.s32.totalorder %s943_s19, 1 }
   0xa   : > { %p1619_p4 = por %p1609_p1, %p54_p0  ;;  %p944_p5 = scmp.ge.s32.totalorder %s1545_s17, 1 }
   0xb   : > { %p1624_p6 = por %p128_p3, %p54_p0  ;;  %p135_p7 = scmp.lt.s32.totalorder %s1545_s17, 3 }
   0xc   : > { %s146_s26 = sshll.u32 %s1763_s1, 4  ;;  %s1547_s28 = smov [#allocation5]   ;;  %s147_s26 = int_to_ptr.hbm [resolvable:$true] %s146_s26 }
   0xd   : > { %p1632_p8 = pnand %p944_p5, %p135_p7  ;;  %s148_s29 = sshll.u32 %s1547_s28, 4  ;;  %s149_s29 = int_to_ptr.vmem [resolvable:$true] %s148_s29 }
   0xe   : > { %p947_p11 = scmp.ge.s32.totalorder %s1545_s17, 2  ;;  %s161_s5 = sshll.u32 %s1764_s2, 4  ;;  %s162_s5 = int_to_ptr.hbm [resolvable:$true] %s161_s5 }
   0xf   : > { %p1292_p9 = pneg %p1632_p8  ;;  %s1548_s6 = smov 512  }
  0x10   : > { %s1549_s7 = smov 32   ;;  %s1550_s8 = smov [#allocation7]  }
  0x11   : > { %p1293_p10 = pnand %p1292_p9, %p1609_p1  ;;  %s163_s9 = sshll.u32 %s1550_s8, 4  ;;  %s164_s9 = int_to_ptr.vmem [resolvable:$true] %s163_s9 }
  0x12   : > { %s32_s10 = sadd.s32 1, %s1541_s16  ;;  %s41_s11 = sadd.s32 1, %s1533_s14 }
  0x13   : > { %1295 = dma.hbm_to_vmem [thread:$0]  (!%p1293_p10), %s147_s26, 8192, %s149_s29, [#allocation6], %s1548_s6, %s1548_s6, %s1549_s7  }
  0x14   : > { %1298 = dma.hbm_to_vmem [thread:$0]  (!%p1293_p10), %s162_s5, 128, %s164_s9, [#allocation6]  }
  0x15   : > { %p34_p12 = scmp.ge.s32.totalorder %s32_s10, 2  ;;  %p48_p13 = scmp.ne.s32.totalorder %s1533_s14, %s1529_s13 }
  0x16   : > { %p49_p0 = scmp.eq.s32.totalorder %s1545_s17, 0  ;;  %p1309_p3 = scmp.lt.s32.totalorder %s1545_s17, 2 }
  0x17   : > { %s1778_s10 = smov (%p34_p12, %s32_s10), 0  ;;  %p1654_p7 = por %p1613_p2, %p48_p13 }
  0x18   : > { %p50_p5 = por %p49_p0, %p48_p13  ;;  %s36_s19 = ssub.s32 %s1541_s16, %s1778_s10 }
  0x19   : > { %s174_s24 = sand.u32 1, %s1533_s14   ;;  %p39_p9 = scmp.eq.s32.totalorder %s36_s19, 0 }
  0x1a   : > { %s1275_s25 = smul.u32 24, %s174_s24  ;;  %p1300_p10 = pnand %p1309_p3, %p50_p5 }
  0x1b   : > { %s1662_s26 = scalar_select %p39_p9, %s1533_s14, %s41_s11  }
  0x1c   : > { %s1276_s28 = smul.u32 24, %s1541_s16  ;;  %s178_s29 = scalar_lea.vmem [#allocation2], %s1275_s25 }
  0x1d   : > { %s188_s30 = sshll.u32 %s178_s29, 4  ;;  %s175_s7 = scalar_lea.sflag [#allocation3], %s174_s24  ;;  %s189_s30 = int_to_ptr.vmem [resolvable:$true] %s188_s30 }
  0x1e   : > { %s185_s6 = scalar_lea.hbm %s1762_s0, %s1276_s28  ;;  %s1551_s8 = smov 128  }
  0x1f   : > { %s186_s21 = sshll.u32 %s185_s6, 4  ;;  %s1552_s9 = smov 8   ;;  %s187_s21 = int_to_ptr.hbm [resolvable:$true] %s186_s21 }
  0x20   : > { %1302 = dma.hbm_to_vmem [thread:$0]  (!%p1300_p10), %s187_s21, 384, %s189_s30, %s175_s7, %s1551_s8, %s1551_s8, %s1552_s9  }
  0x21   : > { %200 = sbr.rel (%p1632_p8) target bundleno = 266 (0x10a), region = 32  ;;  %s1671_s11 = sand.u32 (!%p1632_p8), 1, %s1529_s13  }
  0x22   : > { %s1277_s19 = smul.u32 (!%p1632_p8), 24, %s1671_s11  ;;  %s203_s25 = scalar_lea.sflag (!%p1632_p8), [#allocation3], %s1671_s11 }
  0x24   : > { %s1675_s29 = scalar_lea.vmem (!%p1632_p8), [#allocation2], %s1277_s19 }
  0x26   : > { %1512 = dma.done.wait (%p1619_p4), %s203_s25, 384  }
  0x27   : > { %1514 = vsyncadd (%p1619_p4), %s203_s25, 4294966912 }
  0x28   : > { %1516 = dma.done.wait (%p1609_p1), [#allocation6], 8320  }
  0x29   : > { %1518 = vsyncadd (%p1609_p1), [#allocation6], 4294958976  ;;  %v1178_v0 = vld [vmem:[#allocation5 + $0x1c0] sm:$0xf]  ;;  %v1267_v2 = vld [vmem:[#allocation5 + $0x1c4] sm:$0xf] }
  0x2a   : > { %v1271_v1 = vld [vmem:[#allocation5 + $0x1dc] sm:$0xf0]  ;;  %v1180_v4 = vld [vmem:[#allocation5 + $0x1e0] sm:$0xf0]  ;;  %v1186_v5 = vld [vmem:[#allocation5 + $0x1c8] sm:$0xf] }
  0x2b   : > { %v1179_v3 = vor.u32 %v1271_v1, %v1178_v0  ;;  %v1272_v6 = vld [vmem:[#allocation5 + $0x1e4] sm:$0xf0]  ;;  %v1183_v7 = vor.u32 %v1267_v2, %v1180_v4  ;;  %v1268_v9 = vld [vmem:[#allocation5 + $0x1cc] sm:$0xf]  ;;  %v1146_v11 = vld [vmem:[#allocation5 + $0x180] sm:$0xf] }
  0x2c   : > { %v1187_v8 = vor.u32 %v1272_v6, %v1186_v5  ;;  %v1188_v10 = vld [vmem:[#allocation5 + $0x1e8] sm:$0xf0]  ;;  %v1263_v13 = vld [vmem:[#allocation5 + $0x19c] sm:$0xf0]  ;;  %v1259_v14 = vld [vmem:[#allocation5 + $0x184] sm:$0xf] }
  0x2d   : > { %649 = vmatpush.bf16.msra.mxu0 %v1179_v3  ;;  %v1191_v12 = vor.u32 %v1268_v9, %v1188_v10  ;;  %v1148_v15 = vld [vmem:[#allocation5 + $0x1a0] sm:$0xf0]  ;;  %667 = vmatpush.bf16.msra.mxu1 %v1183_v7  ;;  %v1147_v16 = vor.u32 %v1263_v13, %v1146_v11  ;;  %v1154_v18 = vld [vmem:[#allocation5 + $0x188] sm:$0xf]  ;;  %v1260_v20 = vld [vmem:[#allocation5 + $0x18c] sm:$0xf] }
  0x2e   : > { %685 = vmatpush.bf16.msra.mxu2 %v1187_v8  ;;  %v1151_v17 = vor.u32 %v1259_v14, %v1148_v15  ;;  %v1264_v19 = vld [vmem:[#allocation5 + $0x1a4] sm:$0xf0]  ;;  %v1156_v22 = vld [vmem:[#allocation5 + $0x1a8] sm:$0xf0]  ;;  %v1114_v23 = vld [vmem:[#allocation5 + $0x140] sm:$0xf] }
  0x2f   : > { %703 = vmatpush.bf16.msra.mxu3 %v1191_v12  ;;  %v1155_v21 = vor.u32 %v1264_v19, %v1154_v18  ;;  %v1255_v24 = vld [vmem:[#allocation5 + $0x15c] sm:$0xf0]  ;;  %v1159_v25 = vor.u32 %v1260_v20, %v1156_v22  ;;  %v1251_v26 = vld [vmem:[#allocation5 + $0x144] sm:$0xf]  ;;  %v1122_v28 = vld [vmem:[#allocation5 + $0x148] sm:$0xf] }
  0x30   : > { %v1116_v27 = vld [vmem:[#allocation5 + $0x160] sm:$0xf0]  ;;  %v1115_v29 = vor.u32 %v1255_v24, %v1114_v23  ;;  %v1256_v30 = vld [vmem:[#allocation5 + $0x164] sm:$0xf0]  ;;  %v1252_v31 = vld [vmem:[#allocation5 + $0x14c] sm:$0xf] }
  0x31   : > { %650 = vmatpush.bf16.msra.mxu0 %v1147_v16  ;;  %v1124_v32 = vld [vmem:[#allocation5 + $0x168] sm:$0xf0]  ;;  %668 = vmatpush.bf16.msra.mxu1 %v1151_v17  ;;  %v1119_v33 = vor.u32 %v1251_v26, %v1116_v27  ;;  %v1123_v34 = vor.u32 %v1256_v30, %v1122_v28  ;;  %v1082_v35 = vld [vmem:[#allocation5 + $0x100] sm:$0xf]  ;;  %v1243_v37 = vld [vmem:[#allocation5 + $0x104] sm:$0xf] }
  0x32   : > { %686 = vmatpush.bf16.msra.mxu2 %v1155_v21  ;;  %v1247_v36 = vld [vmem:[#allocation5 + $0x11c] sm:$0xf0]  ;;  %v1127_v38 = vor.u32 %v1252_v31, %v1124_v32  ;;  %v1084_v39 = vld [vmem:[#allocation5 + $0x120] sm:$0xf0]  ;;  %v1090_v40 = vld [vmem:[#allocation5 + $0x108] sm:$0xf] }
  0x33   : > { %704 = vmatpush.bf16.msra.mxu3 %v1159_v25  ;;  %v1248_v41 = vld [vmem:[#allocation5 + $0x124] sm:$0xf0]  ;;  %v1244_v42 = vld [vmem:[#allocation5 + $0x10c] sm:$0xf]  ;;  %v1083_v44 = vor.u32 %v1247_v36, %v1082_v35  ;;  %v1087_v45 = vor.u32 %v1243_v37, %v1084_v39  ;;  %v1050_v47 = vld [vmem:[#allocation5 + $0xc0] sm:$0xf] }
  0x34   : > { %v1092_v43 = vld [vmem:[#allocation5 + $0x128] sm:$0xf0]  ;;  %v1091_v46 = vor.u32 %v1248_v41, %v1090_v40  ;;  %v1239_v48 = vld [vmem:[#allocation5 + $0xdc] sm:$0xf0]  ;;  %v1235_v49 = vld [vmem:[#allocation5 + $0xc4] sm:$0xf] }
  0x35   : > { %651 = vmatpush.bf16.msra.mxu0 %v1115_v29  ;;  %669 = vmatpush.bf16.msra.mxu1 %v1119_v33  ;;  %v1095_v50 = vor.u32 %v1244_v42, %v1092_v43  ;;  %v1052_v51 = vld [vmem:[#allocation5 + $0xe0] sm:$0xf0]  ;;  %v1058_v52 = vld [vmem:[#allocation5 + $0xc8] sm:$0xf]  ;;  %v1236_v54 = vld [vmem:[#allocation5 + $0xcc] sm:$0xf]  ;;  %v1051_v56 = vor.u32 %v1239_v48, %v1050_v47 }
  0x36   : > { %687 = vmatpush.bf16.msra.mxu2 %v1123_v34  ;;  %v1240_v53 = vld [vmem:[#allocation5 + $0xe4] sm:$0xf0]  ;;  %v1060_v55 = vld [vmem:[#allocation5 + $0xe8] sm:$0xf0]  ;;  %v1055_v57 = vor.u32 %v1235_v49, %v1052_v51  ;;  %v1018_v59 = vld [vmem:[#allocation5 + $0x80] sm:$0xf] }
  0x37   : > { %705 = vmatpush.bf16.msra.mxu3 %v1127_v38  ;;  %v1059_v58 = vor.u32 %v1240_v53, %v1058_v52  ;;  %v1231_v60 = vld [vmem:[#allocation5 + $0x9c] sm:$0xf0]  ;;  %v1227_v61 = vld [vmem:[#allocation5 + $0x84] sm:$0xf]  ;;  %v1063_v62 = vor.u32 %v1236_v54, %v1060_v55  ;;  %v1026_v0 = vld [vmem:[#allocation5 + $0x88] sm:$0xf] }
  0x38   : > { %v1020_v63 = vld [vmem:[#allocation5 + $0xa0] sm:$0xf0]  ;;  %v1232_v1 = vld [vmem:[#allocation5 + $0xa4] sm:$0xf0]  ;;  %v1228_v2 = vld [vmem:[#allocation5 + $0x8c] sm:$0xf]  ;;  %v1019_v4 = vor.u32 %v1231_v60, %v1018_v59 }
  0x39   : > { %652 = vmatpush.bf16.msra.mxu0 %v1083_v44  ;;  %670 = vmatpush.bf16.msra.mxu1 %v1087_v45  ;;  %v1028_v3 = vld [vmem:[#allocation5 + $0xa8] sm:$0xf0]  ;;  %v1023_v5 = vor.u32 %v1227_v61, %v1020_v63  ;;  %v1027_v6 = vor.u32 %v1232_v1, %v1026_v0  ;;  %v986_v7 = vld [vmem:[#allocation5 + $0x40] sm:$0xf]  ;;  %v1219_v9 = vld [vmem:[#allocation5 + $0x44] sm:$0xf] }
  0x3a   : > { %688 = vmatpush.bf16.msra.mxu2 %v1091_v46  ;;  %v1223_v8 = vld [vmem:[#allocation5 + $0x5c] sm:$0xf0]  ;;  %v1031_v10 = vor.u32 %v1228_v2, %v1028_v3  ;;  %v988_v11 = vld [vmem:[#allocation5 + $0x60] sm:$0xf0]  ;;  %v994_v12 = vld [vmem:[#allocation5 + $0x48] sm:$0xf] }
  0x3b   : > { %706 = vmatpush.bf16.msra.mxu3 %v1095_v50  ;;  %v1224_v13 = vld [vmem:[#allocation5 + $0x64] sm:$0xf0]  ;;  %v1220_v14 = vld [vmem:[#allocation5 + $0x4c] sm:$0xf]  ;;  %v987_v16 = vor.u32 %v1223_v8, %v986_v7  ;;  %v954_v17 = vld [vmem:[#allocation5] sm:$0xf]  ;;  %v991_v19 = vor.u32 %v1219_v9, %v988_v11 }
  0x3c   : > { %v996_v15 = vld [vmem:[#allocation5 + $0x68] sm:$0xf0]  ;;  %v1215_v18 = vld [vmem:[#allocation5 + $0x1c] sm:$0xf0]  ;;  %v995_v20 = vor.u32 %v1224_v13, %v994_v12  ;;  %v1211_v21 = vld [vmem:[#allocation5 + $0x4] sm:$0xf] }
  0x3d   : > { %653 = vmatpush.bf16.msra.mxu0 %v1051_v56  ;;  %671 = vmatpush.bf16.msra.mxu1 %v1055_v57  ;;  %v956_v22 = vld [vmem:[#allocation5 + $0x20] sm:$0xf0]  ;;  %v962_v23 = vld [vmem:[#allocation5 + $0x8] sm:$0xf]  ;;  %v999_v24 = vor.u32 %v1220_v14, %v996_v15  ;;  %v1212_v26 = vld [vmem:[#allocation5 + $0xc] sm:$0xf]  ;;  %v955_v31 = vor.u32 %v1215_v18, %v954_v17 }
  0x3e   : > { %689 = vmatpush.bf16.msra.mxu2 %v1059_v58  ;;  %v1216_v25 = vld [vmem:[#allocation5 + $0x24] sm:$0xf0]  ;;  %v964_v27 = vld [vmem:[#allocation5 + $0x28] sm:$0xf0]  ;;  %v1202_v29 = vld [vmem:[#allocation5 + $0x1d8] sm:$0xf]  ;;  %v959_v35 = vor.u32 %v1211_v21, %v956_v22 }
  0x3f   : > { %707 = vmatpush.bf16.msra.mxu3 %v1063_v62  ;;  %v242_v28 = vld [vmem:[%s1675_s29] sm:$0xff]  ;;  %v1274_v30 = vld [vmem:[#allocation5 + $0x1f4] sm:$0xf0]  ;;  %v1270_v33 = vld [vmem:[#allocation5 + $0x1dc] sm:$0xf]  ;;  %v963_v36 = vor.u32 %v1216_v25, %v962_v23  ;;  %v967_v37 = vor.u32 %v1212_v26, %v964_v27  ;;  %s1278_s20 = smul.u32 96, %s1671_s11 }
  0x40   : > { %v243_v32 = vld [vmem:[%s1675_s29 + $0x8] sm:$0xff]  ;;  %v1203_v38 = vor.u32 %v1274_v30, %v1202_v29  ;;  %s1279_s27 = smul.u32 96, %s1537_s15  ;;  %s818_s15 = scalar_lea.sflag [#allocation4], %s1671_s11 }
  0x41   : > { %654 = vmatpush.bf16.msra.mxu0 %v1019_v4  ;;  %672 = vmatpush.bf16.msra.mxu1 %v1023_v5  ;;  %v1204_v34 = vld [vmem:[#allocation5 + $0x1f8] sm:$0xf0]  ;;  %v1194_v39 = vld [vmem:[#allocation5 + $0x1d0] sm:$0xf]  ;;  %v1269_v41 = vld [vmem:[#allocation5 + $0x1d4] sm:$0xf]  ;;  %v1687_v42 = vpack.c.bf16 %v243_v32, %v242_v28 }
  0x42   : > { %690 = vmatpush.bf16.msra.mxu2 %v1027_v6  ;;  %v1273_v40 = vld [vmem:[#allocation5 + $0x1ec] sm:$0xf0]  ;;  %v1207_v43 = vor.u32 %v1270_v33, %v1204_v34  ;;  %v1196_v44 = vld [vmem:[#allocation5 + $0x1f0] sm:$0xf0]  ;;  %v1170_v45 = vld [vmem:[#allocation5 + $0x198] sm:$0xf]  ;;  %s832_s30 = scalar_lea.hbm %s1765_s3, %s1279_s27 }
  0x43   : > { %708 = vmatpush.bf16.msra.mxu3 %v1031_v10  ;;  %v1266_v46 = vld [vmem:[#allocation5 + $0x1b4] sm:$0xf0]  ;;  %v1262_v47 = vld [vmem:[#allocation5 + $0x19c] sm:$0xf]  ;;  %v1195_v49 = vor.u32 %v1273_v40, %v1194_v39  ;;  %v1199_v50 = vor.u32 %v1269_v41, %v1196_v44  ;;  %v1162_v52 = vld [vmem:[#allocation5 + $0x190] sm:$0xf] }
  0x44   : > { %v1172_v48 = vld [vmem:[#allocation5 + $0x1b8] sm:$0xf0]  ;;  %v1171_v51 = vor.u32 %v1266_v46, %v1170_v45  ;;  %v1265_v53 = vld [vmem:[#allocation5 + $0x1ac] sm:$0xf0]  ;;  %v1261_v54 = vld [vmem:[#allocation5 + $0x194] sm:$0xf] }
  0x45   : > { %655 = vmatpush.bf16.msra.mxu0 %v987_v16  ;;  %673 = vmatpush.bf16.msra.mxu1 %v991_v19  ;;  %v1175_v55 = vor.u32 %v1262_v47, %v1172_v48  ;;  %v1164_v56 = vld [vmem:[#allocation5 + $0x1b0] sm:$0xf0]  ;;  %v1138_v57 = vld [vmem:[#allocation5 + $0x158] sm:$0xf]  ;;  %v1254_v59 = vld [vmem:[#allocation5 + $0x15c] sm:$0xf]  ;;  %v1163_v61 = vor.u32 %v1265_v53, %v1162_v52 }
  0x46   : > { %691 = vmatpush.bf16.msra.mxu2 %v995_v20  ;;  %v1258_v58 = vld [vmem:[#allocation5 + $0x174] sm:$0xf0]  ;;  %v1140_v60 = vld [vmem:[#allocation5 + $0x178] sm:$0xf0]  ;;  %v1167_v62 = vor.u32 %v1261_v54, %v1164_v56  ;;  %v1130_v0 = vld [vmem:[#allocation5 + $0x150] sm:$0xf] }
  0x47   : > { %709 = vmatpush.bf16.msra.mxu3 %v999_v24  ;;  %v1139_v63 = vor.u32 %v1258_v58, %v1138_v57  ;;  %v1257_v1 = vld [vmem:[#allocation5 + $0x16c] sm:$0xf0]  ;;  %v1253_v2 = vld [vmem:[#allocation5 + $0x154] sm:$0xf]  ;;  %v1143_v3 = vor.u32 %v1254_v59, %v1140_v60  ;;  %v1106_v5 = vld [vmem:[#allocation5 + $0x118] sm:$0xf] }
  0x48   : > { %v1132_v4 = vld [vmem:[#allocation5 + $0x170] sm:$0xf0]  ;;  %v1250_v6 = vld [vmem:[#allocation5 + $0x134] sm:$0xf0]  ;;  %v1246_v7 = vld [vmem:[#allocation5 + $0x11c] sm:$0xf]  ;;  %v1131_v9 = vor.u32 %v1257_v1, %v1130_v0 }
  0x49   : > { %656 = vmatpush.bf16.msra.mxu0 %v955_v31  ;;  %674 = vmatpush.bf16.msra.mxu1 %v959_v35  ;;  %v1108_v8 = vld [vmem:[#allocation5 + $0x138] sm:$0xf0]  ;;  %v1135_v10 = vor.u32 %v1253_v2, %v1132_v4  ;;  %v1107_v11 = vor.u32 %v1250_v6, %v1106_v5  ;;  %v1098_v12 = vld [vmem:[#allocation5 + $0x110] sm:$0xf]  ;;  %v1245_v14 = vld [vmem:[#allocation5 + $0x114] sm:$0xf] }
  0x4a   : > { %692 = vmatpush.bf16.msra.mxu2 %v963_v36  ;;  %v1249_v13 = vld [vmem:[#allocation5 + $0x12c] sm:$0xf0]  ;;  %v1111_v15 = vor.u32 %v1246_v7, %v1108_v8  ;;  %v1100_v16 = vld [vmem:[#allocation5 + $0x130] sm:$0xf0]  ;;  %v1074_v17 = vld [vmem:[#allocation5 + $0xd8] sm:$0xf] }
  0x4b   : > { %710 = vmatpush.bf16.msra.mxu3 %v967_v37  ;;  %v1242_v18 = vld [vmem:[#allocation5 + $0xf4] sm:$0xf0]  ;;  %v1238_v20 = vld [vmem:[#allocation5 + $0xdc] sm:$0xf]  ;;  %v1099_v22 = vor.u32 %v1249_v13, %v1098_v12  ;;  %v1103_v23 = vor.u32 %v1245_v14, %v1100_v16  ;;  %v1066_v25 = vld [vmem:[#allocation5 + $0xd0] sm:$0xf] }
  0x4c   : > { %657 = vmatmul.bf16.vlgmr.msra.gmra.mxu0 %v1687_v42  ;;  %675 = vmatmul.bf16.vlgmr.msra.gmra.mxu1 %v1687_v42  ;;  %v244_v19 = vld [vmem:[%s1675_s29 + $0x10] sm:$0xff]  ;;  %v1075_v24 = vor.u32 %v1242_v18, %v1074_v17  ;;  %v1241_v26 = vld [vmem:[#allocation5 + $0xec] sm:$0xf0]  ;;  %v1237_v27 = vld [vmem:[#allocation5 + $0xd4] sm:$0xf]  ;;  %s1709_s22 = scalar_lea.vmem [#allocation8], %s1278_s20 }
  0x4d   : > { %693 = vmatmul.bf16.vlgmr.msra.gmra.mxu2 %v1687_v42  ;;  %721 = vmatpush.bf16.msrb.mxu0 %v1195_v49  ;;  %v1076_v21 = vld [vmem:[#allocation5 + $0xf8] sm:$0xf0]  ;;  %v1694_v28 = vpack.c.bf16 %v244_v19, %v244_v19  ;;  %v1068_v30 = vld [vmem:[#allocation5 + $0xf0] sm:$0xf0]  ;;  %v1042_v31 = vld [vmem:[#allocation5 + $0x98] sm:$0xf]  ;;  %v1067_v35 = vor.u32 %v1241_v26, %v1066_v25 }
  0x4e   : > { %757 = vmatpush.bf16.msrb.mxu2 %v1203_v38  ;;  %711 = vmatmul.bf16.vlgmr.msra.gmra.mxu3 %v1687_v42  ;;  %v1079_v29 = vor.u32 %v1238_v20, %v1076_v21  ;;  %v1234_v32 = vld [vmem:[#allocation5 + $0xb4] sm:$0xf0]  ;;  %v1230_v33 = vld [vmem:[#allocation5 + $0x9c] sm:$0xf]  ;;  %v1071_v36 = vor.u32 %v1237_v27, %v1068_v30  ;;  %v1034_v38 = vld [vmem:[#allocation5 + $0x90] sm:$0xf] }
  0x4f   : > { %775 = vmatpush.bf16.msrb.mxu3 %v1207_v43  ;;  %739 = vmatpush.bf16.msrb.mxu1 %v1199_v50  ;;  %v1044_v34 = vld [vmem:[#allocation5 + $0xb8] sm:$0xf0]  ;;  %v1043_v37 = vor.u32 %v1234_v32, %v1042_v31  ;;  %v1233_v39 = vld [vmem:[#allocation5 + $0xac] sm:$0xf0]  ;;  %v1229_v40 = vld [vmem:[#allocation5 + $0x94] sm:$0xf] }
  0x50   : > { %v1047_v41 = vor.u32 %v1230_v33, %v1044_v34  ;;  %v1036_v43 = vld [vmem:[#allocation5 + $0xb0] sm:$0xf0]  ;;  %v1010_v44 = vld [vmem:[#allocation5 + $0x58] sm:$0xf]  ;;  %v1222_v46 = vld [vmem:[#allocation5 + $0x5c] sm:$0xf]  ;;  %v1035_v48 = vor.u32 %v1233_v39, %v1034_v38 }
  0x51   : > { %722 = vmatpush.bf16.msrb.mxu0 %v1163_v61  ;;  %v1226_v45 = vld [vmem:[#allocation5 + $0x74] sm:$0xf0]  ;;  %v1012_v47 = vld [vmem:[#allocation5 + $0x78] sm:$0xf0]  ;;  %v1039_v49 = vor.u32 %v1229_v40, %v1036_v43  ;;  %v1225_v52 = vld [vmem:[#allocation5 + $0x6c] sm:$0xf0] }
  0x52   : > { %758 = vmatpush.bf16.msrb.mxu2 %v1171_v51  ;;  %v1011_v50 = vor.u32 %v1226_v45, %v1010_v44  ;;  %v1002_v51 = vld [vmem:[#allocation5 + $0x50] sm:$0xf]  ;;  %v1221_v53 = vld [vmem:[#allocation5 + $0x54] sm:$0xf]  ;;  %v1015_v54 = vor.u32 %v1222_v46, %v1012_v47  ;;  %v978_v56 = vld [vmem:[#allocation5 + $0x18] sm:$0xf] }
  0x53   : > { %776 = vmatpush.bf16.msrb.mxu3 %v1175_v55  ;;  %740 = vmatpush.bf16.msrb.mxu1 %v1167_v62  ;;  %v1004_v55 = vld [vmem:[#allocation5 + $0x70] sm:$0xf0]  ;;  %v1218_v57 = vld [vmem:[#allocation5 + $0x34] sm:$0xf0]  ;;  %v1214_v58 = vld [vmem:[#allocation5 + $0x1c] sm:$0xf]  ;;  %v1003_v60 = vor.u32 %v1225_v52, %v1002_v51 }
  0x54   : > { %v980_v59 = vld [vmem:[#allocation5 + $0x38] sm:$0xf0]  ;;  %v1007_v61 = vor.u32 %v1221_v53, %v1004_v55  ;;  %v979_v62 = vor.u32 %v1218_v57, %v978_v56  ;;  %v1217_v0 = vld [vmem:[#allocation5 + $0x2c] sm:$0xf0]  ;;  %v1213_v2 = vld [vmem:[#allocation5 + $0x14] sm:$0xf] }
  0x55   : > { %723 = vmatpush.bf16.msrb.mxu0 %v1131_v9  ;;  %v983_v1 = vor.u32 %v1214_v58, %v980_v59  ;;  %v311_v6 = vld [vmem:[#allocation7] sm:$0xff]  ;;  %s833_s4 = sshll.u32 %s1709_s22, 4  ;;  %s835_s5 = sshll.u32 %s832_s30, 4  ;;  %s834_s4 = int_to_ptr.vmem [resolvable:$true] %s833_s4  ;;  %s836_s5 = int_to_ptr.hbm [resolvable:$true] %s835_s5 }
  0x56   : > { %759 = vmatpush.bf16.msrb.mxu2 %v1139_v63  ;;  %v970_v63 = vld [vmem:[#allocation5 + $0x10] sm:$0xf]  ;;  %v313_v7 = vperm.slane %v311_v6, 0  ;;  %v314_v8 = vperm.slane %v311_v6, 1  ;;  %v315_v14 = vperm.slane %v311_v6, 2  ;;  %v317_v43 = vperm.slane %v311_v6, 4 }
  0x57   : > { %777 = vmatpush.bf16.msrb.mxu3 %v1143_v3  ;;  %741 = vmatpush.bf16.msrb.mxu1 %v1135_v10  ;;  %v972_v3 = vld [vmem:[#allocation5 + $0x30] sm:$0xf0]  ;;  %v971_v4 = vor.u32 %v1217_v0, %v970_v63  ;;  %v318_v45 = vperm.slane %v311_v6, 5  ;;  %v319_v51 = vperm.slane %v311_v6, 6  ;;  %v320_v53 = vperm.slane %v311_v6, 7  ;;  %s1473_s6 = sshra.s32 %s836_s5, 4  ;;  %s1474_s6 = int_to_ptr.hbm [resolvable:$true] %s1473_s6 }
  0x58   : > { %v975_v5 = vor.u32 %v1213_v2, %v972_v3  ;;  %s1475_s21 = scalar_lea.hbm %s1474_s6, 96  ;;  %s1479_s9 = scalar_lea.hbm %s1765_s3, 192 }
  0x59   : > { %724 = vmatpush.bf16.msrb.mxu0 %v1099_v22  ;;  %p1476_p1 = scmp.ne.s32.totalorder %s1474_s6, %s1475_s21  ;;  %p1480_p8 = scmp.lt.s32.totalorder %s1474_s6, %s1765_s3 }
  0x5a   : > { %760 = vmatpush.bf16.msrb.mxu2 %v1107_v11  ;;  %p1481_p12 = scmp.lt.s32.totalorder %s1479_s9, %s1475_s21 }
  0x5b   : > { %778 = vmatpush.bf16.msrb.mxu3 %v1111_v15  ;;  %742 = vmatpush.bf16.msrb.mxu1 %v1103_v23  ;;  %v316_v15 = vperm.slane %v311_v6, 3  ;;  %p1477_p2 = pnand %p1476_p1, %p1654_p7 }
  0x5c   : > { %662 = vmatmul.bf16.gmra.mxu0 %v1694_v28  ;;  %680 = vmatmul.bf16.gmra.mxu1 %v1694_v28  ;;  %p1482_p13 = por %p1481_p12, %p1480_p8 }
  0x5d   : > { %698 = vmatmul.bf16.gmra.mxu2 %v1694_v28  ;;  %725 = vmatpush.bf16.msrb.mxu0 %v1067_v35  ;;  %p1478_p4 = pneg %p1477_p2 }
  0x5e   : > { %761 = vmatpush.bf16.msrb.mxu2 %v1075_v24  ;;  %716 = vmatmul.bf16.gmra.mxu3 %v1694_v28 }
  0x5f   : > { %779 = vmatpush.bf16.msrb.mxu3 %v1079_v29  ;;  %743 = vmatpush.bf16.msrb.mxu1 %v1071_v36  ;;  %p1483_p0 = pnand %p1482_p13, %p1478_p4 }
  0x61   : > { %726 = vmatpush.bf16.msrb.mxu0 %v1035_v48 }
  0x62   : > { %762 = vmatpush.bf16.msrb.mxu2 %v1043_v37 }
  0x63   : > { %780 = vmatpush.bf16.msrb.mxu3 %v1047_v41  ;;  %744 = vmatpush.bf16.msrb.mxu1 %v1039_v49 }
  0x65   : > { %727 = vmatpush.bf16.msrb.mxu0 %v1003_v60 }
  0x66   : > { %763 = vmatpush.bf16.msrb.mxu2 %v1011_v50 }
  0x67   : > { %781 = vmatpush.bf16.msrb.mxu3 %v1015_v54  ;;  %745 = vmatpush.bf16.msrb.mxu1 %v1007_v61 }
  0x69   : > { %728 = vmatpush.bf16.msrb.mxu0 %v971_v4 }
  0x6a   : > { %764 = vmatpush.bf16.msrb.mxu2 %v979_v62 }
  0x6b   : > { %782 = vmatpush.bf16.msrb.mxu3 %v983_v1  ;;  %746 = vmatpush.bf16.msrb.mxu1 %v975_v5 }
  0x6c   : > { %729 = vmatmul.bf16.vlgmr.msrb.gmra.mxu0 %v1687_v42 }
  0x6d   : > { %765 = vmatmul.bf16.vlgmr.msrb.gmra.mxu2 %v1687_v42 }
  0x6e   : > { %747 = vmatmul.bf16.vlgmr.msrb.gmra.mxu1 %v1687_v42  ;;  %783 = vmatmul.bf16.vlgmr.msrb.gmra.mxu3 %v1687_v42 }
  0x7c   : > { %734 = vmatmul.bf16.gmra.mxu0 %v1694_v28 }
  0x7d   : > { %770 = vmatmul.bf16.gmra.mxu2 %v1694_v28 }
  0x7e   : > { %752 = vmatmul.bf16.gmra.mxu1 %v1694_v28  ;;  %788 = vmatmul.bf16.gmra.mxu3 %v1694_v28 }
  0xc9   : > { %v658_v9 = vpop.f32.mrf.mxu0  ;;  %v676_v11 = vpop.f32.mrf.mxu1 }
  0xca   : > { %v659_v10 = vadd.f32 %v658_v9, %v313_v7  ;;  %v677_v12 = vadd.f32 %v676_v11, %v314_v8 }
  0xcc   : > { %v793_v13 = vpack.c.bf16 %v677_v12, %v659_v10 }
  0xce   : > { %805 = vst [vmem:[%s1709_s22] sm:$0xff] %v793_v13 }
  0xd0   : > { %v694_v42 = vpop.f32.mrf.mxu2 }
  0xd1   : > { %v695_v16 = vadd.f32 %v694_v42, %v315_v14  ;;  %v712_v17 = vpop.f32.mrf.mxu3  ;;  %v660_v18 = vpop.f32.mrf.mxu0 }
  0xd2   : > { %v713_v19 = vadd.f32 %v712_v17, %v316_v15  ;;  %v661_v20 = vadd.f32 %v660_v18, %v313_v7  ;;  %v678_v21 = vpop.f32.mrf.mxu1 }
  0xd3   : > { %v679_v22 = vadd.f32 %v678_v21, %v314_v8 }
  0xd4   : > { %v794_v23 = vpack.c.bf16 %v713_v19, %v695_v16 }
  0xd5   : > { %v797_v24 = vpack.c.bf16 %v679_v22, %v661_v20 }
  0xd6   : > { %806 = vst [vmem:[%s1709_s22 + $0x8] sm:$0xff] %v794_v23 }
  0xd7   : > { %809 = vst [vmem:[%s1709_s22 + $0x20] sm:$0xff] %v797_v24 }
  0xd8   : > { %v696_v25 = vpop.f32.mrf.mxu2 }
  0xd9   : > { %v697_v26 = vadd.f32 %v696_v25, %v315_v14  ;;  %v714_v27 = vpop.f32.mrf.mxu3  ;;  %v663_v28 = vpop.f32.mrf.mxu0 }
  0xda   : > { %v715_v29 = vadd.f32 %v714_v27, %v316_v15  ;;  %v664_v30 = vadd.f32 %v663_v28, %v313_v7  ;;  %v681_v31 = vpop.f32.mrf.mxu1 }
  0xdb   : > { %v682_v32 = vadd.f32 %v681_v31, %v314_v8 }
  0xdc   : > { %v798_v33 = vpack.c.bf16 %v715_v29, %v697_v26 }
  0xdd   : > { %v801_v34 = vpack.c.bf16 %v682_v32, %v664_v30 }
  0xde   : > { %810 = vst [vmem:[%s1709_s22 + $0x28] sm:$0xff] %v798_v33 }
  0xdf   : > { %813 = vst [vmem:[%s1709_s22 + $0x40] sm:$0xff] %v801_v34 }
  0xe0   : > { %v699_v35 = vpop.f32.mrf.mxu2 }
  0xe1   : > { %v700_v36 = vadd.f32 %v699_v35, %v315_v14  ;;  %v717_v37 = vpop.f32.mrf.mxu3  ;;  %v665_v38 = vpop.f32.mrf.mxu0 }
  0xe2   : > { %v718_v39 = vadd.f32 %v717_v37, %v316_v15  ;;  %v683_v40 = vpop.f32.mrf.mxu1 }
  0xe4   : > { %v802_v41 = vpack.c.bf16 %v718_v39, %v700_v36 }
  0xe6   : > { %814 = vst [vmem:[%s1709_s22 + $0x48] sm:$0xff] %v802_v41 }
  0xe8   : > { %v701_v44 = vpop.f32.mrf.mxu2 }
  0xe9   : > { %v719_v46 = vpop.f32.mrf.mxu3  ;;  %v730_v47 = vpop.f32.mrf.mxu0 }
  0xea   : > { %v731_v48 = vadd.f32 %v730_v47, %v317_v43 }
  0xeb   : > { %v748_v49 = vpop.f32.mrf.mxu1 }
  0xec   : > { %v749_v50 = vadd.f32 %v748_v49, %v318_v45 }
  0xee   : > { %v795_v52 = vpack.c.bf16 %v749_v50, %v731_v48 }
  0xf0   : > { %807 = vst [vmem:[%s1709_s22 + $0x10] sm:$0xff] %v795_v52  ;;  %v766_v54 = vpop.f32.mrf.mxu2 }
  0xf1   : > { %v767_v55 = vadd.f32 %v766_v54, %v319_v51  ;;  %v784_v56 = vpop.f32.mrf.mxu3  ;;  %v732_v58 = vpop.f32.mrf.mxu0 }
  0xf2   : > { %v785_v57 = vadd.f32 %v784_v56, %v320_v53  ;;  %v733_v59 = vadd.f32 %v732_v58, %v317_v43 }
  0xf3   : > { %v750_v60 = vpop.f32.mrf.mxu1 }
  0xf4   : > { %v796_v61 = vpack.c.bf16 %v785_v57, %v767_v55  ;;  %v751_v62 = vadd.f32 %v750_v60, %v318_v45 }
  0xf6   : > { %808 = vst [vmem:[%s1709_s22 + $0x18] sm:$0xff] %v796_v61  ;;  %v799_v63 = vpack.c.bf16 %v751_v62, %v733_v59 }
  0xf8   : > { %811 = vst [vmem:[%s1709_s22 + $0x30] sm:$0xff] %v799_v63  ;;  %v768_v0 = vpop.f32.mrf.mxu2 }
  0xf9   : > { %v769_v1 = vadd.f32 %v768_v0, %v319_v51  ;;  %v786_v2 = vpop.f32.mrf.mxu3  ;;  %v735_v4 = vpop.f32.mrf.mxu0 }
  0xfa   : > { %v787_v3 = vadd.f32 %v786_v2, %v320_v53  ;;  %v736_v5 = vadd.f32 %v735_v4, %v317_v43 }
  0xfb   : > { %v753_v6 = vpop.f32.mrf.mxu1 }
  0xfc   : > { %v800_v7 = vpack.c.bf16 %v787_v3, %v769_v1  ;;  %v754_v8 = vadd.f32 %v753_v6, %v318_v45 }
  0xfe   : > { %812 = vst [vmem:[%s1709_s22 + $0x38] sm:$0xff] %v800_v7  ;;  %v803_v9 = vpack.c.bf16 %v754_v8, %v736_v5 }
 0x100   : > { %815 = vst [vmem:[%s1709_s22 + $0x50] sm:$0xff] %v803_v9  ;;  %v771_v10 = vpop.f32.mrf.mxu2 }
 0x101   : > { %v772_v11 = vadd.f32 %v771_v10, %v319_v51  ;;  %v789_v12 = vpop.f32.mrf.mxu3  ;;  %v737_v14 = vpop.f32.mrf.mxu0 }
 0x102   : > { %v790_v13 = vadd.f32 %v789_v12, %v320_v53 }
 0x103   : > { %v755_v15 = vpop.f32.mrf.mxu1 }
 0x104   : > { %v804_v42 = vpack.c.bf16 %v790_v13, %v772_v11 }
 0x106   : > { %816 = vst [vmem:[%s1709_s22 + $0x58] sm:$0xff] %v804_v42 }
 0x107   : > { %1486 = shalt.err (!%p1483_p0)
}
 0x108   : > { %s1553_s11 = smov 512   ;;  %s1554_s29 = smov 32   ;;  %v773_v16 = vpop.f32.mrf.mxu2 }
 0x109   : > { %1290 = dma.vmem_to_hbm [thread:$0]  (%p1654_p7), %s834_s4, 1536, %s836_s5, %s818_s15, %s1553_s11, %s1553_s11, %s1554_s29   ;;  %v791_v17 = vpop.f32.mrf.mxu3 }
 0x10a PF: > { %s850_s20 = sand.u32 1, %s1525_s12   ;;  %p1304_p3 = pnand %p947_p11, %p1624_p6 }
 0x10b   : > { %s851_s22 = scalar_lea.sflag [#allocation4], %s850_s20 }
 0x10c   : > { %p1305_p5 = pneg %p1304_p3 }
 0x10e   : > { %1520 = dma.done.wait (%p1305_p5), %s851_s22, 1536  }
 0x10f   : > { %1522 = vsyncadd (%p1305_p5), %s851_s22, 4294965760  ;;  %s20_s17 = sadd.s32 1, %s1545_s17   ;;  %s1772_s12 = smov %s1529_s13 }
 0x110   : > { %p17_p9 = scmp.ge.s32.totalorder %s20_s17, 4   ;;  %s1773_s13 = smov %s1533_s14 }
 0x111   : > { %s1774_s14 = smov %s1662_s26  ;;  %s1775_s15 = smov %s1541_s16 }
 0x112   : > { %s1776_s16 = smov %s1778_s10  ;;  %19 = sbr.rel (!%p17_p9) target bundleno = 7 (0x7), region = 85 }
 0x117   :  { %857 = vsyncpa [#allocation3], 1 }
 0x118   :  { %859 = vsyncpa [#allocation3 + $0x1], 1 }
 0x119   :  { %860 = vsyncpa [#allocation6], 1 }
 0x11a   :  { %861 = vsyncpa [#allocation4], 1 }
 0x11b   :  { %863 = vsyncpa [#allocation4 + $0x1], 1 }

// kernel: tpu_custom_call.1
= control target key start
LH: loop header
LB: loop body
LE: loop exit
PB: predicated region body
PF: predicated region fallthrough
CT: control target
= control target key end

     0   :  { %8 = vsyncpa [#allocation3], 0  ;;  %s1762_s0 = inlined_call_operand.hbm [shape: f32[2,24,128], index: 0, kind: input, shape index: {}]   ;;  %s1763_s1 = inlined_call_operand.hbm [shape: bf16[128,1024], index: 1, kind: input, shape index: {}]   ;;  %s1764_s2 = inlined_call_operand.hbm [shape: f32[1,1024], index: 2, kind: input, shape index: {}]   ;;  %s1765_s3 = inlined_call_operand.hbm [shape: bf16[2,24,1024], index: 3, kind: output, shape index: {}]  }
   0x1   :  { %10 = vsyncpa [#allocation3 + $0x1], 0 }
   0x2   :  { %11 = vsyncpa [#allocation6], 0 }
   0x3   :  { %12 = vsyncpa [#allocation4], 0 }
   0x4   :  { %14 = vsyncpa [#allocation4 + $0x1], 0  ;;  %s1575_s12 = smov 0   ;;  %s1577_s13 = smov 0  }
   0x5   :  { %s1579_s14 = smov 0   ;;  %s1581_s15 = smov 0  }
   0x6   :  { %s1583_s16 = smov 0   ;;  %s1585_s17 = smov 0  }
   0x7 LB: > { %s942_s18 = sadd.s32 4294967295, %s1545_s17   ;;  %s943_s19 = sadd.s32 4294967294, %s1545_s17   ;;  %s1545_s17 = sphi %s1585_s17, %s20_s17   ;;  %s1541_s16 = sphi %s1583_s16, %s1776_s16   ;;  %s1537_s15 = sphi %s1581_s15, %s1775_s15   ;;  %s1533_s14 = sphi %s1579_s14, %s1774_s14   ;;  %s1529_s13 = sphi %s1577_s13, %s1773_s13   ;;  %s1525_s12 = sphi %s1575_s12, %s1772_s12  }
   0x8   : > { %p54_p0 = scmp.ne.s32.totalorder %s1529_s13, %s1525_s12  ;;  %p1609_p1 = scmp.eq.s32.totalorder %s942_s18, 0 }
   0x9   : > { %p1613_p2 = scmp.eq.s32.totalorder %s942_s18, 1  ;;  %p128_p3 = scmp.eq.s32.totalorder %s943_s19, 1 }
   0xa   : > { %p1619_p4 = por %p1609_p1, %p54_p0  ;;  %p944_p5 = scmp.ge.s32.totalorder %s1545_s17, 1 }
   0xb   : > { %p1624_p6 = por %p128_p3, %p54_p0  ;;  %p135_p7 = scmp.lt.s32.totalorder %s1545_s17, 3 }
   0xc   : > { %s146_s26 = sshll.u32 %s1763_s1, 4  ;;  %s1547_s28 = smov [#allocation5]   ;;  %s147_s26 = int_to_ptr.hbm [resolvable:$true] %s146_s26 }
   0xd   : > { %p1632_p8 = pnand %p944_p5, %p135_p7  ;;  %s148_s29 = sshll.u32 %s1547_s28, 4  ;;  %s149_s29 = int_to_ptr.vmem [resolvable:$true] %s148_s29 }
   0xe   : > { %p947_p11 = scmp.ge.s32.totalorder %s1545_s17, 2  ;;  %s161_s5 = sshll.u32 %s1764_s2, 4  ;;  %s162_s5 = int_to_ptr.hbm [resolvable:$true] %s161_s5 }
   0xf   : > { %p1292_p9 = pneg %p1632_p8  ;;  %s1548_s6 = smov 512  }
  0x10   : > { %s1549_s7 = smov 32   ;;  %s1550_s8 = smov [#allocation7]  }
  0x11   : > { %p1293_p10 = pnand %p1292_p9, %p1609_p1  ;;  %s163_s9 = sshll.u32 %s1550_s8, 4  ;;  %s164_s9 = int_to_ptr.vmem [resolvable:$true] %s163_s9 }
  0x12   : > { %s32_s10 = sadd.s32 1, %s1541_s16  ;;  %s41_s11 = sadd.s32 1, %s1533_s14 }
  0x13   : > { %1295 = dma.hbm_to_vmem [thread:$0]  (!%p1293_p10), %s147_s26, 8192, %s149_s29, [#allocation6], %s1548_s6, %s1548_s6, %s1549_s7  }
  0x14   : > { %1298 = dma.hbm_to_vmem [thread:$0]  (!%p1293_p10), %s162_s5, 128, %s164_s9, [#allocation6]  }
  0x15   : > { %p34_p12 = scmp.ge.s32.totalorder %s32_s10, 2  ;;  %p48_p13 = scmp.ne.s32.totalorder %s1533_s14, %s1529_s13 }
  0x16   : > { %p49_p0 = scmp.eq.s32.totalorder %s1545_s17, 0  ;;  %p1309_p3 = scmp.lt.s32.totalorder %s1545_s17, 2 }
  0x17   : > { %s1778_s10 = smov (%p34_p12, %s32_s10), 0  ;;  %p1654_p7 = por %p1613_p2, %p48_p13 }
  0x18   : > { %p50_p5 = por %p49_p0, %p48_p13  ;;  %s36_s19 = ssub.s32 %s1541_s16, %s1778_s10 }
  0x19   : > { %s174_s24 = sand.u32 1, %s1533_s14   ;;  %p39_p9 = scmp.eq.s32.totalorder %s36_s19, 0 }
  0x1a   : > { %s1275_s25 = smul.u32 24, %s174_s24  ;;  %p1300_p10 = pnand %p1309_p3, %p50_p5 }
  0x1b   : > { %s1662_s26 = scalar_select %p39_p9, %s1533_s14, %s41_s11  }
  0x1c   : > { %s1276_s28 = smul.u32 24, %s1541_s16  ;;  %s178_s29 = scalar_lea.vmem [#allocation2], %s1275_s25 }
  0x1d   : > { %s188_s30 = sshll.u32 %s178_s29, 4  ;;  %s175_s7 = scalar_lea.sflag [#allocation3], %s174_s24  ;;  %s189_s30 = int_to_ptr.vmem [resolvable:$true] %s188_s30 }
  0x1e   : > { %s185_s6 = scalar_lea.hbm %s1762_s0, %s1276_s28  ;;  %s1551_s8 = smov 128  }
  0x1f   : > { %s186_s21 = sshll.u32 %s185_s6, 4  ;;  %s1552_s9 = smov 8   ;;  %s187_s21 = int_to_ptr.hbm [resolvable:$true] %s186_s21 }
  0x20   : > { %1302 = dma.hbm_to_vmem [thread:$0]  (!%p1300_p10), %s187_s21, 384, %s189_s30, %s175_s7, %s1551_s8, %s1551_s8, %s1552_s9  }
  0x21   : > { %200 = sbr.rel (%p1632_p8) target bundleno = 266 (0x10a), region = 32  ;;  %s1671_s11 = sand.u32 (!%p1632_p8), 1, %s1529_s13  }
  0x22   : > { %s1277_s19 = smul.u32 (!%p1632_p8), 24, %s1671_s11  ;;  %s203_s25 = scalar_lea.sflag (!%p1632_p8), [#allocation3], %s1671_s11 }
  0x24   : > { %s1675_s29 = scalar_lea.vmem (!%p1632_p8), [#allocation2], %s1277_s19 }
  0x26   : > { %1512 = dma.done.wait (%p1619_p4), %s203_s25, 384  }
  0x27   : > { %1514 = vsyncadd (%p1619_p4), %s203_s25, 4294966912 }
  0x28   : > { %1516 = dma.done.wait (%p1609_p1), [#allocation6], 8320  }
  0x29   : > { %1518 = vsyncadd (%p1609_p1), [#allocation6], 4294958976  ;;  %v1178_v0 = vld [vmem:[#allocation5 + $0x1c0] sm:$0xf]  ;;  %v1267_v2 = vld [vmem:[#allocation5 + $0x1c4] sm:$0xf] }
  0x2a   : > { %v1271_v1 = vld [vmem:[#allocation5 + $0x1dc] sm:$0xf0]  ;;  %v1180_v4 = vld [vmem:[#allocation5 + $0x1e0] sm:$0xf0]  ;;  %v1186_v5 = vld [vmem:[#allocation5 + $0x1c8] sm:$0xf] }
  0x2b   : > { %v1179_v3 = vor.u32 %v1271_v1, %v1178_v0  ;;  %v1272_v6 = vld [vmem:[#allocation5 + $0x1e4] sm:$0xf0]  ;;  %v1183_v7 = vor.u32 %v1267_v2, %v1180_v4  ;;  %v1268_v9 = vld [vmem:[#allocation5 + $0x1cc] sm:$0xf]  ;;  %v1146_v11 = vld [vmem:[#allocation5 + $0x180] sm:$0xf] }
  0x2c   : > { %v1187_v8 = vor.u32 %v1272_v6, %v1186_v5  ;;  %v1188_v10 = vld [vmem:[#allocation5 + $0x1e8] sm:$0xf0]  ;;  %v1263_v13 = vld [vmem:[#allocation5 + $0x19c] sm:$0xf0]  ;;  %v1259_v14 = vld [vmem:[#allocation5 + $0x184] sm:$0xf] }
  0x2d   : > { %649 = vmatpush.bf16.msra.mxu0 %v1179_v3  ;;  %v1191_v12 = vor.u32 %v1268_v9, %v1188_v10  ;;  %v1148_v15 = vld [vmem:[#allocation5 + $0x1a0] sm:$0xf0]  ;;  %667 = vmatpush.bf16.msra.mxu1 %v1183_v7  ;;  %v1147_v16 = vor.u32 %v1263_v13, %v1146_v11  ;;  %v1154_v18 = vld [vmem:[#allocation5 + $0x188] sm:$0xf]  ;;  %v1260_v20 = vld [vmem:[#allocation5 + $0x18c] sm:$0xf] }
  0x2e   : > { %685 = vmatpush.bf16.msra.mxu2 %v1187_v8  ;;  %v1151_v17 = vor.u32 %v1259_v14, %v1148_v15  ;;  %v1264_v19 = vld [vmem:[#allocation5 + $0x1a4] sm:$0xf0]  ;;  %v1156_v22 = vld [vmem:[#allocation5 + $0x1a8] sm:$0xf0]  ;;  %v1114_v23 = vld [vmem:[#allocation5 + $0x140] sm:$0xf] }
  0x2f   : > { %703 = vmatpush.bf16.msra.mxu3 %v1191_v12  ;;  %v1155_v21 = vor.u32 %v1264_v19, %v1154_v18  ;;  %v1255_v24 = vld [vmem:[#allocation5 + $0x15c] sm:$0xf0]  ;;  %v1159_v25 = vor.u32 %v1260_v20, %v1156_v22  ;;  %v1251_v26 = vld [vmem:[#allocation5 + $0x144] sm:$0xf]  ;;  %v1122_v28 = vld [vmem:[#allocation5 + $0x148] sm:$0xf] }
  0x30   : > { %v1116_v27 = vld [vmem:[#allocation5 + $0x160] sm:$0xf0]  ;;  %v1115_v29 = vor.u32 %v1255_v24, %v1114_v23  ;;  %v1256_v30 = vld [vmem:[#allocation5 + $0x164] sm:$0xf0]  ;;  %v1252_v31 = vld [vmem:[#allocation5 + $0x14c] sm:$0xf] }
  0x31   : > { %650 = vmatpush.bf16.msra.mxu0 %v1147_v16  ;;  %v1124_v32 = vld [vmem:[#allocation5 + $0x168] sm:$0xf0]  ;;  %668 = vmatpush.bf16.msra.mxu1 %v1151_v17  ;;  %v1119_v33 = vor.u32 %v1251_v26, %v1116_v27  ;;  %v1123_v34 = vor.u32 %v1256_v30, %v1122_v28  ;;  %v1082_v35 = vld [vmem:[#allocation5 + $0x100] sm:$0xf]  ;;  %v1243_v37 = vld [vmem:[#allocation5 + $0x104] sm:$0xf] }
  0x32   : > { %686 = vmatpush.bf16.msra.mxu2 %v1155_v21  ;;  %v1247_v36 = vld [vmem:[#allocation5 + $0x11c] sm:$0xf0]  ;;  %v1127_v38 = vor.u32 %v1252_v31, %v1124_v32  ;;  %v1084_v39 = vld [vmem:[#allocation5 + $0x120] sm:$0xf0]  ;;  %v1090_v40 = vld [vmem:[#allocation5 + $0x108] sm:$0xf] }
  0x33   : > { %704 = vmatpush.bf16.msra.mxu3 %v1159_v25  ;;  %v1248_v41 = vld [vmem:[#allocation5 + $0x124] sm:$0xf0]  ;;  %v1244_v42 = vld [vmem:[#allocation5 + $0x10c] sm:$0xf]  ;;  %v1083_v44 = vor.u32 %v1247_v36, %v1082_v35  ;;  %v1087_v45 = vor.u32 %v1243_v37, %v1084_v39  ;;  %v1050_v47 = vld [vmem:[#allocation5 + $0xc0] sm:$0xf] }
  0x34   : > { %v1092_v43 = vld [vmem:[#allocation5 + $0x128] sm:$0xf0]  ;;  %v1091_v46 = vor.u32 %v1248_v41, %v1090_v40  ;;  %v1239_v48 = vld [vmem:[#allocation5 + $0xdc] sm:$0xf0]  ;;  %v1235_v49 = vld [vmem:[#allocation5 + $0xc4] sm:$0xf] }
  0x35   : > { %651 = vmatpush.bf16.msra.mxu0 %v1115_v29  ;;  %669 = vmatpush.bf16.msra.mxu1 %v1119_v33  ;;  %v1095_v50 = vor.u32 %v1244_v42, %v1092_v43  ;;  %v1052_v51 = vld [vmem:[#allocation5 + $0xe0] sm:$0xf0]  ;;  %v1058_v52 = vld [vmem:[#allocation5 + $0xc8] sm:$0xf]  ;;  %v1236_v54 = vld [vmem:[#allocation5 + $0xcc] sm:$0xf]  ;;  %v1051_v56 = vor.u32 %v1239_v48, %v1050_v47 }
  0x36   : > { %687 = vmatpush.bf16.msra.mxu2 %v1123_v34  ;;  %v1240_v53 = vld [vmem:[#allocation5 + $0xe4] sm:$0xf0]  ;;  %v1060_v55 = vld [vmem:[#allocation5 + $0xe8] sm:$0xf0]  ;;  %v1055_v57 = vor.u32 %v1235_v49, %v1052_v51  ;;  %v1018_v59 = vld [vmem:[#allocation5 + $0x80] sm:$0xf] }
  0x37   : > { %705 = vmatpush.bf16.msra.mxu3 %v1127_v38  ;;  %v1059_v58 = vor.u32 %v1240_v53, %v1058_v52  ;;  %v1231_v60 = vld [vmem:[#allocation5 + $0x9c] sm:$0xf0]  ;;  %v1227_v61 = vld [vmem:[#allocation5 + $0x84] sm:$0xf]  ;;  %v1063_v62 = vor.u32 %v1236_v54, %v1060_v55  ;;  %v1026_v0 = vld [vmem:[#allocation5 + $0x88] sm:$0xf] }
  0x38   : > { %v1020_v63 = vld [vmem:[#allocation5 + $0xa0] sm:$0xf0]  ;;  %v1232_v1 = vld [vmem:[#allocation5 + $0xa4] sm:$0xf0]  ;;  %v1228_v2 = vld [vmem:[#allocation5 + $0x8c] sm:$0xf]  ;;  %v1019_v4 = vor.u32 %v1231_v60, %v1018_v59 }
  0x39   : > { %652 = vmatpush.bf16.msra.mxu0 %v1083_v44  ;;  %670 = vmatpush.bf16.msra.mxu1 %v1087_v45  ;;  %v1028_v3 = vld [vmem:[#allocation5 + $0xa8] sm:$0xf0]  ;;  %v1023_v5 = vor.u32 %v1227_v61, %v1020_v63  ;;  %v1027_v6 = vor.u32 %v1232_v1, %v1026_v0  ;;  %v986_v7 = vld [vmem:[#allocation5 + $0x40] sm:$0xf]  ;;  %v1219_v9 = vld [vmem:[#allocation5 + $0x44] sm:$0xf] }
  0x3a   : > { %688 = vmatpush.bf16.msra.mxu2 %v1091_v46  ;;  %v1223_v8 = vld [vmem:[#allocation5 + $0x5c] sm:$0xf0]  ;;  %v1031_v10 = vor.u32 %v1228_v2, %v1028_v3  ;;  %v988_v11 = vld [vmem:[#allocation5 + $0x60] sm:$0xf0]  ;;  %v994_v12 = vld [vmem:[#allocation5 + $0x48] sm:$0xf] }
  0x3b   : > { %706 = vmatpush.bf16.msra.mxu3 %v1095_v50  ;;  %v1224_v13 = vld [vmem:[#allocation5 + $0x64] sm:$0xf0]  ;;  %v1220_v14 = vld [vmem:[#allocation5 + $0x4c] sm:$0xf]  ;;  %v987_v16 = vor.u32 %v1223_v8, %v986_v7  ;;  %v954_v17 = vld [vmem:[#allocation5] sm:$0xf]  ;;  %v991_v19 = vor.u32 %v1219_v9, %v988_v11 }
  0x3c   : > { %v996_v15 = vld [vmem:[#allocation5 + $0x68] sm:$0xf0]  ;;  %v1215_v18 = vld [vmem:[#allocation5 + $0x1c] sm:$0xf0]  ;;  %v995_v20 = vor.u32 %v1224_v13, %v994_v12  ;;  %v1211_v21 = vld [vmem:[#allocation5 + $0x4] sm:$0xf] }
  0x3d   : > { %653 = vmatpush.bf16.msra.mxu0 %v1051_v56  ;;  %671 = vmatpush.bf16.msra.mxu1 %v1055_v57  ;;  %v956_v22 = vld [vmem:[#allocation5 + $0x20] sm:$0xf0]  ;;  %v962_v23 = vld [vmem:[#allocation5 + $0x8] sm:$0xf]  ;;  %v999_v24 = vor.u32 %v1220_v14, %v996_v15  ;;  %v1212_v26 = vld [vmem:[#allocation5 + $0xc] sm:$0xf]  ;;  %v955_v31 = vor.u32 %v1215_v18, %v954_v17 }
  0x3e   : > { %689 = vmatpush.bf16.msra.mxu2 %v1059_v58  ;;  %v1216_v25 = vld [vmem:[#allocation5 + $0x24] sm:$0xf0]  ;;  %v964_v27 = vld [vmem:[#allocation5 + $0x28] sm:$0xf0]  ;;  %v1202_v29 = vld [vmem:[#allocation5 + $0x1d8] sm:$0xf]  ;;  %v959_v35 = vor.u32 %v1211_v21, %v956_v22 }
  0x3f   : > { %707 = vmatpush.bf16.msra.mxu3 %v1063_v62  ;;  %v242_v28 = vld [vmem:[%s1675_s29] sm:$0xff]  ;;  %v1274_v30 = vld [vmem:[#allocation5 + $0x1f4] sm:$0xf0]  ;;  %v1270_v33 = vld [vmem:[#allocation5 + $0x1dc] sm:$0xf]  ;;  %v963_v36 = vor.u32 %v1216_v25, %v962_v23  ;;  %v967_v37 = vor.u32 %v1212_v26, %v964_v27  ;;  %s1278_s20 = smul.u32 96, %s1671_s11 }
  0x40   : > { %v243_v32 = vld [vmem:[%s1675_s29 + $0x8] sm:$0xff]  ;;  %v1203_v38 = vor.u32 %v1274_v30, %v1202_v29  ;;  %s1279_s27 = smul.u32 96, %s1537_s15  ;;  %s818_s15 = scalar_lea.sflag [#allocation4], %s1671_s11 }
  0x41   : > { %654 = vmatpush.bf16.msra.mxu0 %v1019_v4  ;;  %672 = vmatpush.bf16.msra.mxu1 %v1023_v5  ;;  %v1204_v34 = vld [vmem:[#allocation5 + $0x1f8] sm:$0xf0]  ;;  %v1194_v39 = vld [vmem:[#allocation5 + $0x1d0] sm:$0xf]  ;;  %v1269_v41 = vld [vmem:[#allocation5 + $0x1d4] sm:$0xf]  ;;  %v1687_v42 = vpack.c.bf16 %v243_v32, %v242_v28 }
  0x42   : > { %690 = vmatpush.bf16.msra.mxu2 %v1027_v6  ;;  %v1273_v40 = vld [vmem:[#allocation5 + $0x1ec] sm:$0xf0]  ;;  %v1207_v43 = vor.u32 %v1270_v33, %v1204_v34  ;;  %v1196_v44 = vld [vmem:[#allocation5 + $0x1f0] sm:$0xf0]  ;;  %v1170_v45 = vld [vmem:[#allocation5 + $0x198] sm:$0xf]  ;;  %s832_s30 = scalar_lea.hbm %s1765_s3, %s1279_s27 }
  0x43   : > { %708 = vmatpush.bf16.msra.mxu3 %v1031_v10  ;;  %v1266_v46 = vld [vmem:[#allocation5 + $0x1b4] sm:$0xf0]  ;;  %v1262_v47 = vld [vmem:[#allocation5 + $0x19c] sm:$0xf]  ;;  %v1195_v49 = vor.u32 %v1273_v40, %v1194_v39  ;;  %v1199_v50 = vor.u32 %v1269_v41, %v1196_v44  ;;  %v1162_v52 = vld [vmem:[#allocation5 + $0x190] sm:$0xf] }
  0x44   : > { %v1172_v48 = vld [vmem:[#allocation5 + $0x1b8] sm:$0xf0]  ;;  %v1171_v51 = vor.u32 %v1266_v46, %v1170_v45  ;;  %v1265_v53 = vld [vmem:[#allocation5 + $0x1ac] sm:$0xf0]  ;;  %v1261_v54 = vld [vmem:[#allocation5 + $0x194] sm:$0xf] }
  0x45   : > { %655 = vmatpush.bf16.msra.mxu0 %v987_v16  ;;  %673 = vmatpush.bf16.msra.mxu1 %v991_v19  ;;  %v1175_v55 = vor.u32 %v1262_v47, %v1172_v48  ;;  %v1164_v56 = vld [vmem:[#allocation5 + $0x1b0] sm:$0xf0]  ;;  %v1138_v57 = vld [vmem:[#allocation5 + $0x158] sm:$0xf]  ;;  %v1254_v59 = vld [vmem:[#allocation5 + $0x15c] sm:$0xf]  ;;  %v1163_v61 = vor.u32 %v1265_v53, %v1162_v52 }
  0x46   : > { %691 = vmatpush.bf16.msra.mxu2 %v995_v20  ;;  %v1258_v58 = vld [vmem:[#allocation5 + $0x174] sm:$0xf0]  ;;  %v1140_v60 = vld [vmem:[#allocation5 + $0x178] sm:$0xf0]  ;;  %v1167_v62 = vor.u32 %v1261_v54, %v1164_v56  ;;  %v1130_v0 = vld [vmem:[#allocation5 + $0x150] sm:$0xf] }
  0x47   : > { %709 = vmatpush.bf16.msra.mxu3 %v999_v24  ;;  %v1139_v63 = vor.u32 %v1258_v58, %v1138_v57  ;;  %v1257_v1 = vld [vmem:[#allocation5 + $0x16c] sm:$0xf0]  ;;  %v1253_v2 = vld [vmem:[#allocation5 + $0x154] sm:$0xf]  ;;  %v1143_v3 = vor.u32 %v1254_v59, %v1140_v60  ;;  %v1106_v5 = vld [vmem:[#allocation5 + $0x118] sm:$0xf] }
  0x48   : > { %v1132_v4 = vld [vmem:[#allocation5 + $0x170] sm:$0xf0]  ;;  %v1250_v6 = vld [vmem:[#allocation5 + $0x134] sm:$0xf0]  ;;  %v1246_v7 = vld [vmem:[#allocation5 + $0x11c] sm:$0xf]  ;;  %v1131_v9 = vor.u32 %v1257_v1, %v1130_v0 }
  0x49   : > { %656 = vmatpush.bf16.msra.mxu0 %v955_v31  ;;  %674 = vmatpush.bf16.msra.mxu1 %v959_v35  ;;  %v1108_v8 = vld [vmem:[#allocation5 + $0x138] sm:$0xf0]  ;;  %v1135_v10 = vor.u32 %v1253_v2, %v1132_v4  ;;  %v1107_v11 = vor.u32 %v1250_v6, %v1106_v5  ;;  %v1098_v12 = vld [vmem:[#allocation5 + $0x110] sm:$0xf]  ;;  %v1245_v14 = vld [vmem:[#allocation5 + $0x114] sm:$0xf] }
  0x4a   : > { %692 = vmatpush.bf16.msra.mxu2 %v963_v36  ;;  %v1249_v13 = vld [vmem:[#allocation5 + $0x12c] sm:$0xf0]  ;;  %v1111_v15 = vor.u32 %v1246_v7, %v1108_v8  ;;  %v1100_v16 = vld [vmem:[#allocation5 + $0x130] sm:$0xf0]  ;;  %v1074_v17 = vld [vmem:[#allocation5 + $0xd8] sm:$0xf] }
  0x4b   : > { %710 = vmatpush.bf16.msra.mxu3 %v967_v37  ;;  %v1242_v18 = vld [vmem:[#allocation5 + $0xf4] sm:$0xf0]  ;;  %v1238_v20 = vld [vmem:[#allocation5 + $0xdc] sm:$0xf]  ;;  %v1099_v22 = vor.u32 %v1249_v13, %v1098_v12  ;;  %v1103_v23 = vor.u32 %v1245_v14, %v1100_v16  ;;  %v1066_v25 = vld [vmem:[#allocation5 + $0xd0] sm:$0xf] }
  0x4c   : > { %657 = vmatmul.bf16.vlgmr.msra.gmra.mxu0 %v1687_v42  ;;  %675 = vmatmul.bf16.vlgmr.msra.gmra.mxu1 %v1687_v42  ;;  %v244_v19 = vld [vmem:[%s1675_s29 + $0x10] sm:$0xff]  ;;  %v1075_v24 = vor.u32 %v1242_v18, %v1074_v17  ;;  %v1241_v26 = vld [vmem:[#allocation5 + $0xec] sm:$0xf0]  ;;  %v1237_v27 = vld [vmem:[#allocation5 + $0xd4] sm:$0xf]  ;;  %s1709_s22 = scalar_lea.vmem [#allocation8], %s1278_s20 }
  0x4d   : > { %693 = vmatmul.bf16.vlgmr.msra.gmra.mxu2 %v1687_v42  ;;  %721 = vmatpush.bf16.msrb.mxu0 %v1195_v49  ;;  %v1076_v21 = vld [vmem:[#allocation5 + $0xf8] sm:$0xf0]  ;;  %v1694_v28 = vpack.c.bf16 %v244_v19, %v244_v19  ;;  %v1068_v30 = vld [vmem:[#allocation5 + $0xf0] sm:$0xf0]  ;;  %v1042_v31 = vld [vmem:[#allocation5 + $0x98] sm:$0xf]  ;;  %v1067_v35 = vor.u32 %v1241_v26, %v1066_v25 }
  0x4e   : > { %757 = vmatpush.bf16.msrb.mxu2 %v1203_v38  ;;  %711 = vmatmul.bf16.vlgmr.msra.gmra.mxu3 %v1687_v42  ;;  %v1079_v29 = vor.u32 %v1238_v20, %v1076_v21  ;;  %v1234_v32 = vld [vmem:[#allocation5 + $0xb4] sm:$0xf0]  ;;  %v1230_v33 = vld [vmem:[#allocation5 + $0x9c] sm:$0xf]  ;;  %v1071_v36 = vor.u32 %v1237_v27, %v1068_v30  ;;  %v1034_v38 = vld [vmem:[#allocation5 + $0x90] sm:$0xf] }
  0x4f   : > { %775 = vmatpush.bf16.msrb.mxu3 %v1207_v43  ;;  %739 = vmatpush.bf16.msrb.mxu1 %v1199_v50  ;;  %v1044_v34 = vld [vmem:[#allocation5 + $0xb8] sm:$0xf0]  ;;  %v1043_v37 = vor.u32 %v1234_v32, %v1042_v31  ;;  %v1233_v39 = vld [vmem:[#allocation5 + $0xac] sm:$0xf0]  ;;  %v1229_v40 = vld [vmem:[#allocation5 + $0x94] sm:$0xf] }
  0x50   : > { %v1047_v41 = vor.u32 %v1230_v33, %v1044_v34  ;;  %v1036_v43 = vld [vmem:[#allocation5 + $0xb0] sm:$0xf0]  ;;  %v1010_v44 = vld [vmem:[#allocation5 + $0x58] sm:$0xf]  ;;  %v1222_v46 = vld [vmem:[#allocation5 + $0x5c] sm:$0xf]  ;;  %v1035_v48 = vor.u32 %v1233_v39, %v1034_v38 }
  0x51   : > { %722 = vmatpush.bf16.msrb.mxu0 %v1163_v61  ;;  %v1226_v45 = vld [vmem:[#allocation5 + $0x74] sm:$0xf0]  ;;  %v1012_v47 = vld [vmem:[#allocation5 + $0x78] sm:$0xf0]  ;;  %v1039_v49 = vor.u32 %v1229_v40, %v1036_v43  ;;  %v1225_v52 = vld [vmem:[#allocation5 + $0x6c] sm:$0xf0] }
  0x52   : > { %758 = vmatpush.bf16.msrb.mxu2 %v1171_v51  ;;  %v1011_v50 = vor.u32 %v1226_v45, %v1010_v44  ;;  %v1002_v51 = vld [vmem:[#allocation5 + $0x50] sm:$0xf]  ;;  %v1221_v53 = vld [vmem:[#allocation5 + $0x54] sm:$0xf]  ;;  %v1015_v54 = vor.u32 %v1222_v46, %v1012_v47  ;;  %v978_v56 = vld [vmem:[#allocation5 + $0x18] sm:$0xf] }
  0x53   : > { %776 = vmatpush.bf16.msrb.mxu3 %v1175_v55  ;;  %740 = vmatpush.bf16.msrb.mxu1 %v1167_v62  ;;  %v1004_v55 = vld [vmem:[#allocation5 + $0x70] sm:$0xf0]  ;;  %v1218_v57 = vld [vmem:[#allocation5 + $0x34] sm:$0xf0]  ;;  %v1214_v58 = vld [vmem:[#allocation5 + $0x1c] sm:$0xf]  ;;  %v1003_v60 = vor.u32 %v1225_v52, %v1002_v51 }
  0x54   : > { %v980_v59 = vld [vmem:[#allocation5 + $0x38] sm:$0xf0]  ;;  %v1007_v61 = vor.u32 %v1221_v53, %v1004_v55  ;;  %v979_v62 = vor.u32 %v1218_v57, %v978_v56  ;;  %v1217_v0 = vld [vmem:[#allocation5 + $0x2c] sm:$0xf0]  ;;  %v1213_v2 = vld [vmem:[#allocation5 + $0x14] sm:$0xf] }
  0x55   : > { %723 = vmatpush.bf16.msrb.mxu0 %v1131_v9  ;;  %v983_v1 = vor.u32 %v1214_v58, %v980_v59  ;;  %v311_v6 = vld [vmem:[#allocation7] sm:$0xff]  ;;  %s833_s4 = sshll.u32 %s1709_s22, 4  ;;  %s835_s5 = sshll.u32 %s832_s30, 4  ;;  %s834_s4 = int_to_ptr.vmem [resolvable:$true] %s833_s4  ;;  %s836_s5 = int_to_ptr.hbm [resolvable:$true] %s835_s5 }
  0x56   : > { %759 = vmatpush.bf16.msrb.mxu2 %v1139_v63  ;;  %v970_v63 = vld [vmem:[#allocation5 + $0x10] sm:$0xf]  ;;  %v313_v7 = vperm.slane %v311_v6, 0  ;;  %v314_v8 = vperm.slane %v311_v6, 1  ;;  %v315_v14 = vperm.slane %v311_v6, 2  ;;  %v317_v43 = vperm.slane %v311_v6, 4 }
  0x57   : > { %777 = vmatpush.bf16.msrb.mxu3 %v1143_v3  ;;  %741 = vmatpush.bf16.msrb.mxu1 %v1135_v10  ;;  %v972_v3 = vld [vmem:[#allocation5 + $0x30] sm:$0xf0]  ;;  %v971_v4 = vor.u32 %v1217_v0, %v970_v63  ;;  %v318_v45 = vperm.slane %v311_v6, 5  ;;  %v319_v51 = vperm.slane %v311_v6, 6  ;;  %v320_v53 = vperm.slane %v311_v6, 7  ;;  %s1473_s6 = sshra.s32 %s836_s5, 4  ;;  %s1474_s6 = int_to_ptr.hbm [resolvable:$true] %s1473_s6 }
  0x58   : > { %v975_v5 = vor.u32 %v1213_v2, %v972_v3  ;;  %s1475_s21 = scalar_lea.hbm %s1474_s6, 96  ;;  %s1479_s9 = scalar_lea.hbm %s1765_s3, 192 }
  0x59   : > { %724 = vmatpush.bf16.msrb.mxu0 %v1099_v22  ;;  %p1476_p1 = scmp.ne.s32.totalorder %s1474_s6, %s1475_s21  ;;  %p1480_p8 = scmp.lt.s32.totalorder %s1474_s6, %s1765_s3 }
  0x5a   : > { %760 = vmatpush.bf16.msrb.mxu2 %v1107_v11  ;;  %p1481_p12 = scmp.lt.s32.totalorder %s1479_s9, %s1475_s21 }
  0x5b   : > { %778 = vmatpush.bf16.msrb.mxu3 %v1111_v15  ;;  %742 = vmatpush.bf16.msrb.mxu1 %v1103_v23  ;;  %v316_v15 = vperm.slane %v311_v6, 3  ;;  %p1477_p2 = pnand %p1476_p1, %p1654_p7 }
  0x5c   : > { %662 = vmatmul.bf16.gmra.mxu0 %v1694_v28  ;;  %680 = vmatmul.bf16.gmra.mxu1 %v1694_v28  ;;  %p1482_p13 = por %p1481_p12, %p1480_p8 }
  0x5d   : > { %698 = vmatmul.bf16.gmra.mxu2 %v1694_v28  ;;  %725 = vmatpush.bf16.msrb.mxu0 %v1067_v35  ;;  %p1478_p4 = pneg %p1477_p2 }
  0x5e   : > { %761 = vmatpush.bf16.msrb.mxu2 %v1075_v24  ;;  %716 = vmatmul.bf16.gmra.mxu3 %v1694_v28 }
  0x5f   : > { %779 = vmatpush.bf16.msrb.mxu3 %v1079_v29  ;;  %743 = vmatpush.bf16.msrb.mxu1 %v1071_v36  ;;  %p1483_p0 = pnand %p1482_p13, %p1478_p4 }
  0x61   : > { %726 = vmatpush.bf16.msrb.mxu0 %v1035_v48 }
  0x62   : > { %762 = vmatpush.bf16.msrb.mxu2 %v1043_v37 }
  0x63   : > { %780 = vmatpush.bf16.msrb.mxu3 %v1047_v41  ;;  %744 = vmatpush.bf16.msrb.mxu1 %v1039_v49 }
  0x65   : > { %727 = vmatpush.bf16.msrb.mxu0 %v1003_v60 }
  0x66   : > { %763 = vmatpush.bf16.msrb.mxu2 %v1011_v50 }
  0x67   : > { %781 = vmatpush.bf16.msrb.mxu3 %v1015_v54  ;;  %745 = vmatpush.bf16.msrb.mxu1 %v1007_v61 }
  0x69   : > { %728 = vmatpush.bf16.msrb.mxu0 %v971_v4 }
  0x6a   : > { %764 = vmatpush.bf16.msrb.mxu2 %v979_v62 }
  0x6b   : > { %782 = vmatpush.bf16.msrb.mxu3 %v983_v1  ;;  %746 = vmatpush.bf16.msrb.mxu1 %v975_v5 }
  0x6c   : > { %729 = vmatmul.bf16.vlgmr.msrb.gmra.mxu0 %v1687_v42 }
  0x6d   : > { %765 = vmatmul.bf16.vlgmr.msrb.gmra.mxu2 %v1687_v42 }
  0x6e   : > { %747 = vmatmul.bf16.vlgmr.msrb.gmra.mxu1 %v1687_v42  ;;  %783 = vmatmul.bf16.vlgmr.msrb.gmra.mxu3 %v1687_v42 }
  0x7c   : > { %734 = vmatmul.bf16.gmra.mxu0 %v1694_v28 }
  0x7d   : > { %770 = vmatmul.bf16.gmra.mxu2 %v1694_v28 }
  0x7e   : > { %752 = vmatmul.bf16.gmra.mxu1 %v1694_v28  ;;  %788 = vmatmul.bf16.gmra.mxu3 %v1694_v28 }
  0xc9   : > { %v658_v9 = vpop.f32.mrf.mxu0  ;;  %v676_v11 = vpop.f32.mrf.mxu1 }
  0xca   : > { %v659_v10 = vadd.f32 %v658_v9, %v313_v7  ;;  %v677_v12 = vadd.f32 %v676_v11, %v314_v8 }
  0xcc   : > { %v793_v13 = vpack.c.bf16 %v677_v12, %v659_v10 }
  0xce   : > { %805 = vst [vmem:[%s1709_s22] sm:$0xff] %v793_v13 }
  0xd0   : > { %v694_v42 = vpop.f32.mrf.mxu2 }
  0xd1   : > { %v695_v16 = vadd.f32 %v694_v42, %v315_v14  ;;  %v712_v17 = vpop.f32.mrf.mxu3  ;;  %v660_v18 = vpop.f32.mrf.mxu0 }
  0xd2   : > { %v713_v19 = vadd.f32 %v712_v17, %v316_v15  ;;  %v661_v20 = vadd.f32 %v660_v18, %v313_v7  ;;  %v678_v21 = vpop.f32.mrf.mxu1 }
  0xd3   : > { %v679_v22 = vadd.f32 %v678_v21, %v314_v8 }
  0xd4   : > { %v794_v23 = vpack.c.bf16 %v713_v19, %v695_v16 }
  0xd5   : > { %v797_v24 = vpack.c.bf16 %v679_v22, %v661_v20 }
  0xd6   : > { %806 = vst [vmem:[%s1709_s22 + $0x8] sm:$0xff] %v794_v23 }
  0xd7   : > { %809 = vst [vmem:[%s1709_s22 + $0x20] sm:$0xff] %v797_v24 }
  0xd8   : > { %v696_v25 = vpop.f32.mrf.mxu2 }
  0xd9   : > { %v697_v26 = vadd.f32 %v696_v25, %v315_v14  ;;  %v714_v27 = vpop.f32.mrf.mxu3  ;;  %v663_v28 = vpop.f32.mrf.mxu0 }
  0xda   : > { %v715_v29 = vadd.f32 %v714_v27, %v316_v15  ;;  %v664_v30 = vadd.f32 %v663_v28, %v313_v7  ;;  %v681_v31 = vpop.f32.mrf.mxu1 }
  0xdb   : > { %v682_v32 = vadd.f32 %v681_v31, %v314_v8 }
  0xdc   : > { %v798_v33 = vpack.c.bf16 %v715_v29, %v697_v26 }
  0xdd   : > { %v801_v34 = vpack.c.bf16 %v682_v32, %v664_v30 }
  0xde   : > { %810 = vst [vmem:[%s1709_s22 + $0x28] sm:$0xff] %v798_v33 }
  0xdf   : > { %813 = vst [vmem:[%s1709_s22 + $0x40] sm:$0xff] %v801_v34 }
  0xe0   : > { %v699_v35 = vpop.f32.mrf.mxu2 }
  0xe1   : > { %v700_v36 = vadd.f32 %v699_v35, %v315_v14  ;;  %v717_v37 = vpop.f32.mrf.mxu3  ;;  %v665_v38 = vpop.f32.mrf.mxu0 }
  0xe2   : > { %v718_v39 = vadd.f32 %v717_v37, %v316_v15  ;;  %v683_v40 = vpop.f32.mrf.mxu1 }
  0xe4   : > { %v802_v41 = vpack.c.bf16 %v718_v39, %v700_v36 }
  0xe6   : > { %814 = vst [vmem:[%s1709_s22 + $0x48] sm:$0xff] %v802_v41 }
  0xe8   : > { %v701_v44 = vpop.f32.mrf.mxu2 }
  0xe9   : > { %v719_v46 = vpop.f32.mrf.mxu3  ;;  %v730_v47 = vpop.f32.mrf.mxu0 }
  0xea   : > { %v731_v48 = vadd.f32 %v730_v47, %v317_v43 }
  0xeb   : > { %v748_v49 = vpop.f32.mrf.mxu1 }
  0xec   : > { %v749_v50 = vadd.f32 %v748_v49, %v318_v45 }
  0xee   : > { %v795_v52 = vpack.c.bf16 %v749_v50, %v731_v48 }
  0xf0   : > { %807 = vst [vmem:[%s1709_s22 + $0x10] sm:$0xff] %v795_v52  ;;  %v766_v54 = vpop.f32.mrf.mxu2 }
  0xf1   : > { %v767_v55 = vadd.f32 %v766_v54, %v319_v51  ;;  %v784_v56 = vpop.f32.mrf.mxu3  ;;  %v732_v58 = vpop.f32.mrf.mxu0 }
  0xf2   : > { %v785_v57 = vadd.f32 %v784_v56, %v320_v53  ;;  %v733_v59 = vadd.f32 %v732_v58, %v317_v43 }
  0xf3   : > { %v750_v60 = vpop.f32.mrf.mxu1 }
  0xf4   : > { %v796_v61 = vpack.c.bf16 %v785_v57, %v767_v55  ;;  %v751_v62 = vadd.f32 %v750_v60, %v318_v45 }
  0xf6   : > { %808 = vst [vmem:[%s1709_s22 + $0x18] sm:$0xff] %v796_v61  ;;  %v799_v63 = vpack.c.bf16 %v751_v62, %v733_v59 }
  0xf8   : > { %811 = vst [vmem:[%s1709_s22 + $0x30] sm:$0xff] %v799_v63  ;;  %v768_v0 = vpop.f32.mrf.mxu2 }
  0xf9   : > { %v769_v1 = vadd.f32 %v768_v0, %v319_v51  ;;  %v786_v2 = vpop.f32.mrf.mxu3  ;;  %v735_v4 = vpop.f32.mrf.mxu0 }
  0xfa   : > { %v787_v3 = vadd.f32 %v786_v2, %v320_v53  ;;  %v736_v5 = vadd.f32 %v735_v4, %v317_v43 }
  0xfb   : > { %v753_v6 = vpop.f32.mrf.mxu1 }
  0xfc   : > { %v800_v7 = vpack.c.bf16 %v787_v3, %v769_v1  ;;  %v754_v8 = vadd.f32 %v753_v6, %v318_v45 }
  0xfe   : > { %812 = vst [vmem:[%s1709_s22 + $0x38] sm:$0xff] %v800_v7  ;;  %v803_v9 = vpack.c.bf16 %v754_v8, %v736_v5 }
 0x100   : > { %815 = vst [vmem:[%s1709_s22 + $0x50] sm:$0xff] %v803_v9  ;;  %v771_v10 = vpop.f32.mrf.mxu2 }
 0x101   : > { %v772_v11 = vadd.f32 %v771_v10, %v319_v51  ;;  %v789_v12 = vpop.f32.mrf.mxu3  ;;  %v737_v14 = vpop.f32.mrf.mxu0 }
 0x102   : > { %v790_v13 = vadd.f32 %v789_v12, %v320_v53 }
 0x103   : > { %v755_v15 = vpop.f32.mrf.mxu1 }
 0x104   : > { %v804_v42 = vpack.c.bf16 %v790_v13, %v772_v11 }
 0x106   : > { %816 = vst [vmem:[%s1709_s22 + $0x58] sm:$0xff] %v804_v42 }
 0x107   : > { %1486 = shalt.err (!%p1483_p0)
}
 0x108   : > { %s1553_s11 = smov 512   ;;  %s1554_s29 = smov 32   ;;  %v773_v16 = vpop.f32.mrf.mxu2 }
 0x109   : > { %1290 = dma.vmem_to_hbm [thread:$0]  (%p1654_p7), %s834_s4, 1536, %s836_s5, %s818_s15, %s1553_s11, %s1553_s11, %s1554_s29   ;;  %v791_v17 = vpop.f32.mrf.mxu3 }
 0x10a PF: > { %s850_s20 = sand.u32 1, %s1525_s12   ;;  %p1304_p3 = pnand %p947_p11, %p1624_p6 }
 0x10b   : > { %s851_s22 = scalar_lea.sflag [#allocation4], %s850_s20 }
 0x10c   : > { %p1305_p5 = pneg %p1304_p3 }
 0x10e   : > { %1520 = dma.done.wait (%p1305_p5), %s851_s22, 1536  }
 0x10f   : > { %1522 = vsyncadd (%p1305_p5), %s851_s22, 4294965760  ;;  %s20_s17 = sadd.s32 1, %s1545_s17   ;;  %s1772_s12 = smov %s1529_s13 }
 0x110   : > { %p17_p9 = scmp.ge.s32.totalorder %s20_s17, 4   ;;  %s1773_s13 = smov %s1533_s14 }
 0x111   : > { %s1774_s14 = smov %s1662_s26  ;;  %s1775_s15 = smov %s1541_s16 }
 0x112   : > { %s1776_s16 = smov %s1778_s10  ;;  %19 = sbr.rel (!%p17_p9) target bundleno = 7 (0x7), region = 85 }
 0x117   :  { %857 = vsyncpa [#allocation3], 1 }
 0x118   :  { %859 = vsyncpa [#allocation3 + $0x1], 1 }
 0x119   :  { %860 = vsyncpa [#allocation6], 1 }
 0x11a   :  { %861 = vsyncpa [#allocation4], 1 }
 0x11b   :  { %863 = vsyncpa [#allocation4 + $0x1], 1 }

</bundles_post_ra>
